<compile_context>
chip_gen: v5e
topology: v5e:2x2
jax: 0.10.0
libtpu: 0.0.40
codegen_flags: <defaults>
</compile_context>

<pallas_src>
import functools

import jax
import jax.numpy as jnp
from jax.experimental import pallas as pl
from jax.experimental.pallas import tpu as pltpu

IN_EPS = 1e-5     # nn.InstanceNorm2d default eps
GEM_P = 3.0
GEM_EPS = 1e-6


# --------------------------------------------------------------------------- #
# Kernels
# --------------------------------------------------------------------------- #
def ir_teacher_head_kernel(x_ref, gamma_ref, beta_ref, w1_ref, w2_ref, feat_ref):
    """Blocks: x (Bt, HW, C) bf16; gamma/beta (1, C) f32; w1 (C, Crp) bf16;
    w2 (Crp, C) bf16; feat out (1, Bt, C) f32."""
    # x arrives as bf16 (halves the dominant HBM read); all math in f32.
    x = x_ref[...].astype(jnp.float32)                       # (Bt, HW, C)
    bt, hw, c = x.shape

    # ---- InstanceNorm2d folded into per-channel scale/shift (one x pass) ----
    mean = jnp.mean(x, axis=1, keepdims=True)                # (Bt, 1, C)
    var = jnp.mean(x * x, axis=1, keepdims=True) - mean * mean
    scale = gamma_ref[...] * jax.lax.rsqrt(var + IN_EPS)     # (Bt, 1, C)
    shift = beta_ref[...] - mean * scale
    x_in = x * scale + shift                                 # affine IN output

    # ---- Mask: 1x1 conv -> ReLU -> 1x1 conv -> Sigmoid ----
    # All Bt*HW pixels batched into one GEMM so the MXU M dimension is filled.
    # Matmul operands bf16, accumulation f32.
    x2d = x_in.reshape(bt * hw, c).astype(jnp.bfloat16)
    h = jnp.maximum(
        jnp.dot(x2d, w1_ref[...], preferred_element_type=jnp.float32), 0.0)
    s = jnp.dot(h.astype(jnp.bfloat16), w2_ref[...],
                preferred_element_type=jnp.float32)          # (Bt*HW, C)
    # Fuse mask application — no separately materialized mask tile.
    y = x_in * jax.nn.sigmoid(s).reshape(bt, hw, c)

    # ---- GeM pooling: clamp(eps)^p -> spatial mean -> ^(1/p) ----
    yc = jnp.maximum(y, GEM_EPS)
    g = jnp.mean(yc * yc * yc, axis=1)                       # cube on VALU, not pow
    feat_ref[0] = g ** (1.0 / GEM_P)                         # tiny (Bt, C) pow only


def classifier_kernel(feat_ref, wc_ref, logits_ref):
    # Whole-batch (B, C) @ (C, NCp) GEMM: bf16 operands, f32 accumulation,
    # lane-dense (128-padded) output stores.
    logits_ref[...] = jnp.dot(feat_ref[...], wc_ref[...],
                              preferred_element_type=jnp.float32)


# --------------------------------------------------------------------------- #
# Sizing helpers
# --------------------------------------------------------------------------- #
@functools.lru_cache(maxsize=None)
def _physical_vmem_bytes():
    try:
        return int(pltpu.get_tpu_info().vmem_capacity_bytes)
    except Exception:
        return 64 << 20          # conservative fallback: v7x per-TC VMEM


def _choose_block_batch(B, HW, C, m_target=512):
    """Batch elements per grid step: fill the MXU M dimension (Bt*HW >= 512,
    good for v6e's 256-wide MXU) while the working set (double-buffered bf16 x
    + ~8 f32 full-tile intermediates) fits the per-generation VMEM budget, and
    keep >= 2 (preferably an even number of) grid steps so both v7x
    TensorCores get work."""
    budget = min(40 << 20, (_physical_vmem_bytes() * 5) // 8)
    per_elem = HW * C * (2 * 2 + 8 * 4)      # bf16 x (2 bufs) + ~8 f32 tiles
    divisors = [d for d in range(1, B + 1) if B % d == 0]
    fitting = [d for d in divisors if d * per_elem <= budget] or [1]
    multi = [d for d in fitting if B // d >= 2] or fitting
    even = [d for d in multi if (B // d) % 2 == 0] or multi
    for d in even:                            # smallest Bt reaching the M target
        if d * HW >= m_target:
            return d
    return even[-1]                           # else the largest fitting Bt


def _vmem_limit_bytes(Bt, HW, C, Crp):
    x_tile = Bt * HW * C * 2                      # bf16 x block
    f32_tile = Bt * HW * C * 4                    # one full-tile f32 intermediate
    h_tile = Bt * HW * Crp * 4                    # mask hidden activation
    weights = 2 * C * 4 + 2 * (C * Crp + Crp * C) * 2
    est = (2 * x_tile                             # double-buffered x
           + 8 * f32_tile                         # live f32 intermediates headroom
           + h_tile
           + 2 * Bt * C * 4                       # double-buffered feat out
           + weights)
    # Never request more scoped VMEM than the chip physically has
    # (v7x: 64 MiB physical -> 48 MiB cap; v5e/v6e: 96 MiB cap).
    cap = min((_physical_vmem_bytes() * 3) // 4, 96 << 20)
    return int(min(max(est, 16 << 20), cap))


@functools.lru_cache(maxsize=None)
def _single_buffer_supported():
    """One-time capability probe for pipeline_mode=pl.Buffered(1).

    The probe compiles a trivial throwaway kernel; the real head kernel is
    never compiled under an except clause, so genuine lowering errors surface.
    """
    if not hasattr(pl, "Buffered"):
        return False

    def _probe(x_ref, o_ref):
        o_ref[...] = x_ref[...]

    try:
        out = pl.pallas_call(
            _probe,
            out_shape=jax.ShapeDtypeStruct((8, 128), jnp.float32),
            grid=(1,),
            in_specs=[pl.BlockSpec((8, 128), lambda i: (0, 0),
                                   pipeline_mode=pl.Buffered(1))],
            out_specs=pl.BlockSpec((8, 128), lambda i: (0, 0)),
        )(jnp.zeros((8, 128), jnp.float32))
        jax.block_until_ready(out)
        return True
    except Exception:       # probe only — does not gate the real kernel's errors
        return False


# --------------------------------------------------------------------------- #
# pallas_call wrappers
# --------------------------------------------------------------------------- #
def _head_call(x_bf16, gamma, beta, w1b, w2b, Bt):
    B, HW, C = x_bf16.shape
    Crp = w1b.shape[1]

    if _single_buffer_supported():
        # Grid-invariant operands: single VMEM buffer (double buffering buys
        # nothing for a constant index_map and doubles their footprint).
        def inv_spec(shape):
            return pl.BlockSpec(shape, lambda b: (0,) * len(shape),
                                pipeline_mode=pl.Buffered(1))
    else:
        def inv_spec(shape):
            return pl.BlockSpec(shape, lambda b: (0,) * len(shape))

    grid_spec = pltpu.PrefetchScalarGridSpec(
        num_scalar_prefetch=0,
        grid=(B // Bt,),
        in_specs=[
            pl.BlockSpec((Bt, HW, C), lambda b: (b, 0, 0)),   # bf16 activations
            inv_spec((1, C)),          # IN gamma (f32)
            inv_spec((1, C)),          # IN beta  (f32)
            inv_spec((C, Crp)),        # mask conv1 weight (bf16)
            inv_spec((Crp, C)),        # mask conv2 weight (bf16)
        ],
        out_specs=pl.BlockSpec((1, Bt, C), lambda b: (b, 0, 0)),
    )
    feat3 = pl.pallas_call(
        ir_teacher_head_kernel,
        out_shape=jax.ShapeDtypeStruct((B // Bt, Bt, C), jnp.float32),
        grid_spec=grid_spec,
        compiler_params=pltpu.CompilerParams(
            dimension_semantics=("parallel",),
            vmem_limit_bytes=_vmem_limit_bytes(Bt, HW, C, Crp)),
    )(x_bf16, gamma, beta, w1b, w2b)
    return feat3.reshape(B, C)


def _classifier(feat, wc):
    B, C = feat.shape
    NC = wc.shape[1]
    NCp = ((NC + 127) // 128) * 128                      # lane-dense output stores
    wc_p = wc if NCp == NC else jnp.pad(wc, ((0, 0), (0, NCp - NC)))
    logits = pl.pallas_call(
        classifier_kernel,
        out_shape=jax.ShapeDtypeStruct((B, NCp), jnp.float32),
    )(feat.astype(jnp.bfloat16), wc_p.astype(jnp.bfloat16))
    return logits[:, :NC] if NCp != NC else logits


def ir_teacher_head(x_bhwc_flat, gamma, beta, w1, w2, wc, block_batch=None):
    """x_bhwc_flat: (B, HW, C); gamma/beta: (1, C); w1: (C, Cr); w2: (Cr, C);
    wc: (C, num_classes). Returns (feat (B, C), logits (B, num_classes))."""
    B, HW, C = x_bhwc_flat.shape
    Cr = w1.shape[1]
    Bt = block_batch if block_batch is not None else _choose_block_batch(B, HW, C)

    # Pad the mask bottleneck dim to a full lane width (avoids masked partial
    # stores when Cr < 128). Zero-padding is exact: extra ReLU(0) columns hit
    # zero rows of w2.
    Crp = max(((Cr + 127) // 128) * 128, 128)
    w1p = w1 if Crp == Cr else jnp.pad(w1, ((0, 0), (0, Crp - Cr)))
    w2p = w2 if Crp == Cr else jnp.pad(w2, ((0, Crp - Cr), (0, 0)))

    # MXU operands and the dominant x DMA go to bf16; in-kernel elementwise
    # math (IN stats, sigmoid, GeM) stays f32 (no bf16 VPU/EUP on v5e anyway).
    xb = x_bhwc_flat.astype(jnp.bfloat16)
    w1b = w1p.astype(jnp.bfloat16)
    w2b = w2p.astype(jnp.bfloat16)

    feat = _head_call(xb, gamma, beta, w1b, w2b, Bt)
    logits = _classifier(feat, wc)
    return feat, logits


# --------------------------------------------------------------------------- #
# Pure-JAX reference (f32 throughout)
# --------------------------------------------------------------------------- #
def reference(x_bhwc_flat, gamma, beta, w1, w2, wc):
    mean = jnp.mean(x_bhwc_flat, axis=1, keepdims=True)
    var = jnp.mean((x_bhwc_flat - mean) ** 2, axis=1, keepdims=True)
    x_in = (x_bhwc_flat - mean) / jnp.sqrt(var + IN_EPS)
    x_in = x_in * gamma[None] + beta[None]
    h = jnp.maximum(jnp.einsum('bsc,cr->bsr', x_in, w1), 0.0)
    m = jax.nn.sigmoid(jnp.einsum('bsr,rc->bsc', h, w2))
    y = x_in * m
    g = jnp.mean(jnp.maximum(y, GEM_EPS) ** GEM_P, axis=1)
    feat = g ** (1.0 / GEM_P)
    logits = feat @ wc
    return feat, logits


if __name__ == "__main__":
    # Small-shape analog of the real head (real: C=2048, r=16, num_classes=1000).
    B, H, W, C = 2, 8, 8, 256
    r = 16
    Cr = C // r            # 16
    NUM_CLASSES = 128
    HW = H * W

    key = jax.random.PRNGKey(0)
    kx, kg, kb, k1, k2, kc = jax.random.split(key, 6)

    # Backbone output features, NCHW in PyTorch -> here (B, HW, C).
    x_nchw = jax.random.normal(kx, (B, C, H, W), dtype=jnp.float32)
    x_flat = jnp.transpose(x_nchw, (0, 2, 3, 1)).reshape(B, HW, C)

    # Parameters (deterministic init; shapes follow the PyTorch module).
    gamma = 1.0 + 0.1 * jax.random.normal(kg, (1, C), dtype=jnp.float32)   # IN weight
    beta = 0.1 * jax.random.normal(kb, (1, C), dtype=jnp.float32)          # IN bias
    # Conv2d(C, C//r, 1, bias=False).weight: (C//r, C, 1, 1) -> matrix (C, C//r)
    w1 = jax.random.normal(k1, (C, Cr), dtype=jnp.float32) / jnp.sqrt(C)
    # Conv2d(C//r, C, 1, bias=False).weight: (C, C//r, 1, 1) -> matrix (C//r, C)
    w2 = jax.random.normal(k2, (Cr, C), dtype=jnp.float32) / jnp.sqrt(Cr)
    # Linear(C, num_classes, bias=False).weight: (num_classes, C) -> matrix (C, NC)
    wc = jax.random.normal(kc, (C, NUM_CLASSES), dtype=jnp.float32) / jnp.sqrt(C)

    feat, logits = ir_teacher_head(x_flat, gamma, beta, w1, w2, wc)
    jax.block_until_ready((feat, logits))

    feat_ref, logits_ref = reference(x_flat, gamma[0], beta[0], w1, w2, wc)
    assert feat.shape == (B, C) and logits.shape == (B, NUM_CLASSES)
    # Tolerance accounts for bf16 activations/weights feeding the GEMMs and the
    # bf16-rounded IN statistics (all accumulation / elementwise math is f32).
    assert jnp.allclose(feat, feat_ref, atol=2e-2, rtol=2e-2)
    assert jnp.allclose(logits, logits_ref, atol=3e-2, rtol=3e-2)

    print("KERNEL_OK")
</pallas_src>

<mosaic_0001>
module attributes {stable_mosaic.version = 11 : i64} {
  func.func @_probe(%arg0: i32, %arg1: memref<8x128xf32, #tpu.memory_space<vmem>>, %arg2: memref<8x128xf32, #tpu.memory_space<vmem>>) attributes {dimension_semantics = [#tpu.dimension_semantics<arbitrary>], iteration_bounds = array<i64: 1>, scalar_prefetch = 0 : i64, scratch_operands = 0 : i64, tpu.core_type = #tpu.core_type<tc>, window_params = [{pipeline_mode = #tpu.pipeline_mode<synchronous>, transform_indices = @transform_0, window_bounds = array<i64: 8, 128>}, {pipeline_mode = #tpu.pipeline_mode<synchronous>, transform_indices = @transform_1, window_bounds = array<i64: 8, 128>}]} {
    %c0 = arith.constant 0 : index
    %c0_0 = arith.constant 0 : index
    %0 = vector.load %arg1[%c0, %c0_0] : memref<8x128xf32, #tpu.memory_space<vmem>>, vector<8x128xf32>
    %c0_1 = arith.constant 0 : index
    %c0_2 = arith.constant 0 : index
    %1 = vector.load %arg2[%c0_1, %c0_2] : memref<8x128xf32, #tpu.memory_space<vmem>>, vector<8x128xf32>
    tpu.vector_store %arg2[%c0_1, %c0_2], %0 {strides = array<i32>} : memref<8x128xf32, #tpu.memory_space<vmem>>, vector<8x128xf32>,
    return
  }
  func.func @transform_0(%arg0: i32) -> (i32, i32) {
    %c0_i32 = arith.constant 0 : i32
    %c0_i32_0 = arith.constant 0 : i32
    %c0_i32_1 = arith.constant 0 : i32
    return %c0_i32, %c0_i32_0 : i32, i32
  }
  func.func @transform_1(%arg0: i32) -> (i32, i32) {
    %c0_i32 = arith.constant 0 : i32
    %c0_i32_0 = arith.constant 0 : i32
    %c0_i32_1 = arith.constant 0 : i32
    return %c0_i32, %c0_i32_0 : i32, i32
  }
}

module attributes {stable_mosaic.version = 11 : i64} {
  func.func @ir_teacher_head_kernel(%arg0: i32, %arg1: memref<1x64x256xbf16, #tpu.memory_space<vmem>>, %arg2: memref<1x256xf32, #tpu.memory_space<vmem>>, %arg3: memref<1x256xf32, #tpu.memory_space<vmem>>, %arg4: memref<256x128xbf16, #tpu.memory_space<vmem>>, %arg5: memref<128x256xbf16, #tpu.memory_space<vmem>>, %arg6: memref<1x1x256xf32, #tpu.memory_space<vmem>>) attributes {dimension_semantics = [#tpu.dimension_semantics<parallel>], iteration_bounds = array<i64: 2>, scalar_prefetch = 0 : i64, scratch_operands = 0 : i64, tpu.core_type = #tpu.core_type<tc>, window_params = [{transform_indices = @transform_0, window_bounds = array<i64: 1, 64, 256>}, {pipeline_mode = #tpu.pipeline_mode<synchronous>, transform_indices = @transform_1, window_bounds = array<i64: 1, 256>}, {pipeline_mode = #tpu.pipeline_mode<synchronous>, transform_indices = @transform_2, window_bounds = array<i64: 1, 256>}, {pipeline_mode = #tpu.pipeline_mode<synchronous>, transform_indices = @transform_3, window_bounds = array<i64: 256, 128>}, {pipeline_mode = #tpu.pipeline_mode<synchronous>, transform_indices = @transform_4, window_bounds = array<i64: 128, 256>}, {transform_indices = @transform_5, window_bounds = array<i64: 1, 1, 256>}]} {
    %c0 = arith.constant 0 : index
    %c0_0 = arith.constant 0 : index
    %c0_1 = arith.constant 0 : index
    %0 = vector.load %arg1[%c0, %c0_0, %c0_1] : memref<1x64x256xbf16, #tpu.memory_space<vmem>>, vector<1x64x256xbf16>
    %1 = arith.extf %0 : vector<1x64x256xbf16> to vector<1x64x256xf32>
    %cst = arith.constant dense<0.000000e+00> : vector<1x256xf32>
    %2 = vector.multi_reduction <add>, %1, %cst [1] : vector<1x64x256xf32> to vector<1x256xf32>
    %3 = vector.shape_cast %2 : vector<1x256xf32> to vector<1x1x256xf32>
    %cst_2 = arith.constant 6.400000e+01 : f32
    %4 = vector.broadcast %cst_2 : f32 to vector<1x1x256xf32>
    %5 = arith.divf %3, %4 : vector<1x1x256xf32>
    %6 = arith.mulf %1, %1 : vector<1x64x256xf32>
    %cst_3 = arith.constant dense<0.000000e+00> : vector<1x256xf32>
    %7 = vector.multi_reduction <add>, %6, %cst_3 [1] : vector<1x64x256xf32> to vector<1x256xf32>
    %8 = vector.shape_cast %7 : vector<1x256xf32> to vector<1x1x256xf32>
    %cst_4 = arith.constant 6.400000e+01 : f32
    %9 = vector.broadcast %cst_4 : f32 to vector<1x1x256xf32>
    %10 = arith.divf %8, %9 : vector<1x1x256xf32>
    %11 = arith.mulf %5, %5 : vector<1x1x256xf32>
    %12 = arith.subf %10, %11 : vector<1x1x256xf32>
    %c0_5 = arith.constant 0 : index
    %c0_6 = arith.constant 0 : index
    %13 = vector.load %arg2[%c0_5, %c0_6] : memref<1x256xf32, #tpu.memory_space<vmem>>, vector<1x256xf32>
    %cst_7 = arith.constant 9.99999974E-6 : f32
    %14 = vector.broadcast %cst_7 : f32 to vector<1x1x256xf32>
    %15 = arith.addf %12, %14 : vector<1x1x256xf32>
    %16 = math.rsqrt %15 : vector<1x1x256xf32>
    %17 = vector.shape_cast %13 : vector<1x256xf32> to vector<1x1x256xf32>
    %18 = arith.mulf %17, %16 : vector<1x1x256xf32>
    %c0_8 = arith.constant 0 : index
    %c0_9 = arith.constant 0 : index
    %19 = vector.load %arg3[%c0_8, %c0_9] : memref<1x256xf32, #tpu.memory_space<vmem>>, vector<1x256xf32>
    %20 = arith.mulf %5, %18 : vector<1x1x256xf32>
    %21 = vector.shape_cast %19 : vector<1x256xf32> to vector<1x1x256xf32>
    %22 = arith.subf %21, %20 : vector<1x1x256xf32>
    %23 = vector.broadcast %18 : vector<1x1x256xf32> to vector<1x64x256xf32>
    %24 = arith.mulf %1, %23 : vector<1x64x256xf32>
    %25 = vector.broadcast %22 : vector<1x1x256xf32> to vector<1x64x256xf32>
    %26 = arith.addf %24, %25 : vector<1x64x256xf32>
    %27 = vector.shape_cast %26 : vector<1x64x256xf32> to vector<64x256xf32>
    %28 = arith.truncf %27 : vector<64x256xf32> to vector<64x256xbf16>
    %c0_10 = arith.constant 0 : index
    %c0_11 = arith.constant 0 : index
    %29 = vector.load %arg4[%c0_10, %c0_11] : memref<256x128xbf16, #tpu.memory_space<vmem>>, vector<256x128xbf16>
    %cst_12 = arith.constant dense<0.000000e+00> : vector<64x128xf32>
    %30 = tpu.matmul %28, %29, %cst_12 {dimension_numbers = #tpu.dot_dimension_numbers<[1], [0], [0], [1], [0, 0, 1, 1], [], []>} : vector<64x256xbf16>, vector<256x128xbf16>, vector<64x128xf32> -> vector<64x128xf32>
    %cst_13 = arith.constant 0.000000e+00 : f32
    %31 = vector.broadcast %cst_13 : f32 to vector<64x128xf32>
    %32 = arith.maximumf %30, %31 : vector<64x128xf32>
    %33 = arith.truncf %32 : vector<64x128xf32> to vector<64x128xbf16>
    %c0_14 = arith.constant 0 : index
    %c0_15 = arith.constant 0 : index
    %34 = vector.load %arg5[%c0_14, %c0_15] : memref<128x256xbf16, #tpu.memory_space<vmem>>, vector<128x256xbf16>
    %cst_16 = arith.constant dense<0.000000e+00> : vector<64x256xf32>
    %35 = tpu.matmul %33, %34, %cst_16 {dimension_numbers = #tpu.dot_dimension_numbers<[1], [0], [0], [1], [0, 0, 1, 1], [], []>} : vector<64x128xbf16>, vector<128x256xbf16>, vector<64x256xf32> -> vector<64x256xf32>
    %36 = arith.negf %35 : vector<64x256xf32>
    %37 = math.exp %36 : vector<64x256xf32>
    %cst_17 = arith.constant 1.000000e+00 : f32
    %38 = vector.broadcast %cst_17 : f32 to vector<64x256xf32>
    %39 = arith.addf %38, %37 : vector<64x256xf32>
    %40 = arith.divf %38, %39 : vector<64x256xf32>
    %41 = vector.shape_cast %40 : vector<64x256xf32> to vector<1x64x256xf32>
    %42 = arith.mulf %26, %41 : vector<1x64x256xf32>
    %cst_18 = arith.constant 9.99999997E-7 : f32
    %43 = vector.broadcast %cst_18 : f32 to vector<1x64x256xf32>
    %44 = arith.maximumf %42, %43 : vector<1x64x256xf32>
    %45 = arith.mulf %44, %44 : vector<1x64x256xf32>
    %46 = arith.mulf %45, %44 : vector<1x64x256xf32>
    %cst_19 = arith.constant dense<0.000000e+00> : vector<1x256xf32>
    %47 = vector.multi_reduction <add>, %46, %cst_19 [1] : vector<1x64x256xf32> to vector<1x256xf32>
    %cst_20 = arith.constant 6.400000e+01 : f32
    %48 = vector.broadcast %cst_20 : f32 to vector<1x256xf32>
    %49 = arith.divf %47, %48 : vector<1x256xf32>
    %cst_21 = arith.constant 0.333333343 : f32
    %50 = vector.broadcast %cst_21 : f32 to vector<1x256xf32>
    %51 = math.powf %49, %50 : vector<1x256xf32>
    %c0_22 = arith.constant 0 : index
    %c0_23 = arith.constant 0 : index
    %c0_24 = arith.constant 0 : index
    %52 = vector.load %arg6[%c0_22, %c0_23, %c0_24] : memref<1x1x256xf32, #tpu.memory_space<vmem>>, vector<1x1x256xf32>
    %53 = vector.shape_cast %52 : vector<1x1x256xf32> to vector<1x256xf32>
    %54 = vector.shape_cast %51 : vector<1x256xf32> to vector<1x1x256xf32>
    tpu.vector_store %arg6[%c0_22, %c0_23, %c0_24], %54 {strides = array<i32>} : memref<1x1x256xf32, #tpu.memory_space<vmem>>, vector<1x1x256xf32>,
    return
  }
  func.func @transform_0(%arg0: i32) -> (i32, i32, i32) {
    %c0_i32 = arith.constant 0 : i32
    %c0_i32_0 = arith.constant 0 : i32
    %c0_i32_1 = arith.constant 0 : i32
    return %arg0, %c0_i32, %c0_i32_0 : i32, i32, i32
  }
  func.func @transform_1(%arg0: i32) -> (i32, i32) {
    %c0_i32 = arith.constant 0 : i32
    %c0_i32_0 = arith.constant 0 : i32
    %c0_i32_1 = arith.constant 0 : i32
    return %c0_i32, %c0_i32_0 : i32, i32
  }
  func.func @transform_2(%arg0: i32) -> (i32, i32) {
    %c0_i32 = arith.constant 0 : i32
    %c0_i32_0 = arith.constant 0 : i32
    %c0_i32_1 = arith.constant 0 : i32
    return %c0_i32, %c0_i32_0 : i32, i32
  }
  func.func @transform_3(%arg0: i32) -> (i32, i32) {
    %c0_i32 = arith.constant 0 : i32
    %c0_i32_0 = arith.constant 0 : i32
    %c0_i32_1 = arith.constant 0 : i32
    return %c0_i32, %c0_i32_0 : i32, i32
  }
  func.func @transform_4(%arg0: i32) -> (i32, i32) {
    %c0_i32 = arith.constant 0 : i32
    %c0_i32_0 = arith.constant 0 : i32
    %c0_i32_1 = arith.constant 0 : i32
    return %c0_i32, %c0_i32_0 : i32, i32
  }
  func.func @transform_5(%arg0: i32) -> (i32, i32, i32) {
    %c0_i32 = arith.constant 0 : i32
    %c0_i32_0 = arith.constant 0 : i32
    %c0_i32_1 = arith.constant 0 : i32
    return %arg0, %c0_i32, %c0_i32_0 : i32, i32, i32
  }
}

</mosaic_0001>

<bundles_post_ra>
// kernel: tpu_custom_call.1
= control target key start
LH: loop header
LB: loop body
LE: loop exit
PB: predicated region body
PF: predicated region fallthrough
CT: control target
= control target key end

     0   :  { %6 = vsyncpa [#allocation3], 0  ;;  %s114_s0 = inlined_call_operand.hbm [shape: f32[8,128], index: 0, kind: input, shape index: {}]   ;;  %s115_s1 = inlined_call_operand.hbm [shape: f32[8,128], index: 1, kind: output, shape index: {}]  }
   0x1   :  { %7 = vsyncpa [#allocation4], 0  ;;  %s13_s8 = sshll.u32 %s114_s0, 4  ;;  %s96_s9 = smov [#allocation2]   ;;  %s14_s8 = int_to_ptr.hbm [resolvable:$true] %s13_s8 }
   0x2   :  { %s15_s10 = sshll.u32 %s96_s9, 4  ;;  %s16_s10 = int_to_ptr.vmem [resolvable:$true] %s15_s10 }
   0x3   :  { %18 = dma.hbm_to_vmem [thread:$0]  %s14_s8, 128, %s16_s10, [#allocation3]  }
   0x4   :  { %92 = dma.done.wait [#allocation3], 128  }
   0x5   :  { %93 = vsyncadd [#allocation3], 4294967168  ;;  %s97_s11 = smov [#allocation5]   ;;  %s32_s15 = sshll.u32 %s115_s1, 4  ;;  %v23_v0 = vld [vmem:[#allocation2] sm:$0xff]  ;;  %s33_s15 = int_to_ptr.hbm [resolvable:$true] %s32_s15 }
   0x6   :  { %s30_s12 = sshll.u32 %s97_s11, 4  ;;  %24 = vst [vmem:[#allocation5] sm:$0xff] %v23_v0  ;;  %s31_s12 = int_to_ptr.vmem [resolvable:$true] %s30_s12 }
   0x7   :  { %35 = dma.vmem_to_hbm [thread:$0]  %s31_s12, 128, %s33_s15, [#allocation4]  }
   0x8   :  { %94 = dma.done.wait [#allocation4], 128  }
   0x9   :  { %95 = vsyncadd [#allocation4], 4294967168 }
   0xa   :  { %40 = vsyncpa [#allocation3], 1 }
   0xb   :  { %41 = vsyncpa [#allocation4], 1 }

// kernel: tpu_custom_call.1
= control target key start
LH: loop header
LB: loop body
LE: loop exit
PB: predicated region body
PF: predicated region fallthrough
CT: control target
= control target key end

     0   :  { %10 = vsyncpa [#allocation3], 0  ;;  %s2815_s0 = inlined_call_operand.hbm [shape: bf16[2,64,256], index: 0, kind: input, shape index: {}]   ;;  %s2816_s1 = inlined_call_operand.hbm [shape: f32[1,256], index: 1, kind: input, shape index: {}]   ;;  %s2817_s2 = inlined_call_operand.hbm [shape: f32[1,256], index: 2, kind: input, shape index: {}]   ;;  %s2818_s3 = inlined_call_operand.hbm [shape: bf16[256,128], index: 3, kind: input, shape index: {}]   ;;  %s2819_s4 = inlined_call_operand.hbm [shape: bf16[128,256], index: 4, kind: input, shape index: {}]   ;;  %s2820_s5 = inlined_call_operand.hbm [shape: f32[2,1,256], index: 5, kind: output, shape index: {}]  }
   0x1   :  { %12 = vsyncpa [#allocation3 + $0x1], 0 }
   0x2   :  { %13 = vsyncpa [#allocation6], 0 }
   0x3   :  { %14 = vsyncpa [#allocation9], 0 }
   0x4   :  { %15 = vsyncpa [#allocation4], 0 }
   0x5   :  { %17 = vsyncpa [#allocation4 + $0x1], 0  ;;  %s2068_s18 = smov 0   ;;  %s2070_s19 = smov 0  }
   0x6   :  { %s2072_s20 = smov 0   ;;  %s2074_s21 = smov 0  }
   0x7 LB: > { %s2089_s22 = sadd.s32 4294967295, %s2027_s21   ;;  %s1387_s23 = sadd.s32 4294967294, %s2027_s21   ;;  %s2027_s21 = sphi %s2074_s21, %s2871_s21   ;;  %s2023_s20 = sphi %s2072_s20, %s2870_s20   ;;  %s2019_s19 = sphi %s2070_s19, %s2869_s19   ;;  %s2015_s18 = sphi %s2068_s18, %s2868_s18  }
   0x8   : > { %p43_p0 = scmp.ne.s32.totalorder %s2019_s19, %s2015_s18  ;;  %p44_p1 = scmp.eq.s32.totalorder %s2089_s22, 0 }
   0x9   : > { %p151_p2 = scmp.eq.s32.totalorder %s2089_s22, 1  ;;  %p157_p3 = scmp.eq.s32.totalorder %s1387_s23, 1 }
   0xa   : > { %p2098_p4 = por %p44_p1, %p43_p0  ;;  %p1388_p5 = scmp.ge.s32.totalorder %s2027_s21, 1 }
   0xb   : > { %p2103_p6 = por %p157_p3, %p43_p0  ;;  %p164_p7 = scmp.lt.s32.totalorder %s2027_s21, 3 }
   0xc   : > { %s176_s28 = sshll.u32 %s2816_s1, 4  ;;  %s2029_s30 = smov [#allocation5]   ;;  %s177_s28 = int_to_ptr.hbm [resolvable:$true] %s176_s28 }
   0xd   : > { %p2111_p8 = pnand %p1388_p5, %p164_p7  ;;  %s178_s6 = sshll.u32 %s2029_s30, 4  ;;  %s179_s6 = int_to_ptr.vmem [resolvable:$true] %s178_s6 }
   0xe   : > { %s199_s9 = sshll.u32 %s2818_s3, 4  ;;  %s2030_s11 = smov [#allocation8]   ;;  %s200_s9 = int_to_ptr.hbm [resolvable:$true] %s199_s9 }
   0xf   : > { %p1653_p10 = pneg %p2111_p8  ;;  %s201_s12 = sshll.u32 %s2030_s11, 4  ;;  %s202_s12 = int_to_ptr.vmem [resolvable:$true] %s201_s12 }
  0x10   : > { %s2031_s13 = smov 64   ;;  %s2032_s14 = smov 4  }
  0x11   : > { %p2123_p11 = pnand %p1653_p10, %p44_p1  ;;  %s188_s17 = sshll.u32 %s2817_s2, 4  ;;  %s189_s17 = int_to_ptr.hbm [resolvable:$true] %s188_s17 }
  0x12   : > { %s2033_s23 = smov [#allocation7]   ;;  %s213_s30 = sshll.u32 %s2819_s4, 4  ;;  %s214_s30 = int_to_ptr.hbm [resolvable:$true] %s213_s30 }
  0x13   : > { %1656 = dma.hbm_to_vmem [thread:$0]  (!%p2123_p11), %s177_s28, 32, %s179_s6, [#allocation6]  }
  0x14   : > { %1662 = dma.hbm_to_vmem [thread:$0]  (!%p2123_p11), %s200_s9, 2048, %s202_s12, [#allocation9], %s2031_s13, %s2031_s13, %s2032_s14  }
  0x15   : > { %s190_s26 = sshll.u32 %s2033_s23, 4  ;;  %s2034_s6 = smov [#allocation10]   ;;  %s191_s26 = int_to_ptr.vmem [resolvable:$true] %s190_s26 }
  0x16   : > { %1659 = dma.hbm_to_vmem [thread:$0]  (!%p2123_p11), %s189_s17, 32, %s191_s26, [#allocation6]  }
  0x17   : > { %s215_s7 = sshll.u32 %s2034_s6, 4  ;;  %s2821_s8 = smov 128   ;;  %s216_s7 = int_to_ptr.vmem [resolvable:$true] %s215_s7 }
  0x18   : > { %s2036_s9 = smov 8   ;;  %s2145_s11 = sadd.s32 1, %s2027_s21  }
  0x19   : > { %1665 = dma.hbm_to_vmem [thread:$0]  (!%p2123_p11), %s214_s30, 2048, %s216_s7, [#allocation9], %s2821_s8, %s2821_s8, %s2036_s9  }
  0x1a   : > { %s27_s12 = ssub.s32 %s2027_s21, %s2145_s11  ;;  %s30_s13 = sadd.s32 1, %s2023_s20 }
  0x1b   : > { %p28_p12 = scmp.eq.s32.totalorder %s27_s12, 0  ;;  %p37_p13 = scmp.ne.s32.totalorder %s2023_s20, %s2019_s19 }
  0x1c   : > { %p38_p0 = scmp.eq.s32.totalorder %s2027_s21, 0  ;;  %p1678_p7 = scmp.lt.s32.totalorder %s2027_s21, 2 }
  0x1d   : > { %s2154_s14 = scalar_select %p28_p12, %s2023_s20, %s30_s13  }
  0x1e   : > { %p39_p3 = por %p38_p0, %p37_p13  ;;  %p2158_p5 = por %p151_p2, %p37_p13 }
  0x1f   : > { %s229_s10 = sand.u32 1, %s2023_s20   ;;  %s1552_s17 = sshll.u32 %s2027_s21, 6 }
  0x20   : > { %s1394_s16 = sshll.u32 %s229_s10, 6  ;;  %s238_s27 = scalar_lea.hbm %s2815_s0, %s1552_s17 }
  0x21   : > { %s233_s28 = scalar_lea.vmem [#allocation2], %s1394_s16  ;;  %s239_s6 = sshll.u32 %s238_s27, 4  ;;  %s240_s6 = int_to_ptr.hbm [resolvable:$true] %s239_s6 }
  0x22   : > { %s241_s30 = sshll.u32 %s233_s28, 4  ;;  %p2168_p10 = pnand %p1678_p7, %p39_p3  ;;  %s242_s30 = int_to_ptr.vmem [resolvable:$true] %s241_s30 }
  0x23   : > { %s230_s12 = scalar_lea.sflag [#allocation3], %s229_s10  ;;  %s1923_s13 = sshra.s32 %s240_s6, 4  ;;  %s1924_s13 = int_to_ptr.hbm [resolvable:$true] %s1923_s13 }
  0x24   : > { %s1925_s8 = scalar_lea.hbm %s1924_s13, 64  ;;  %p1927_p11 = pneg %p2168_p10 }
  0x25   : > { %p1926_p2 = scmp.ne.s32.totalorder %s1924_s13, %s1925_s8  ;;  %s1930_s23 = scalar_lea.hbm %s2815_s0, 128 }
  0x26   : > { %p1931_p0 = scmp.lt.s32.totalorder %s1924_s13, %s2815_s0  ;;  %p1932_p3 = scmp.lt.s32.totalorder %s1930_s23, %s1925_s8 }
  0x27   : > { %p1928_p12 = pnand %p1927_p11, %p1926_p2 }
  0x28   : > { %p1933_p7 = por %p1932_p3, %p1931_p0 }
  0x29   : > { %p1929_p13 = pneg %p1928_p12 }
  0x2b   : > { %p1934_p9 = pnand %p1933_p7, %p1929_p13 }
  0x2d   : > { %1937 = shalt.err (!%p1934_p9)
}
  0x2e   : > { %s2828_s10 = smov 128   ;;  %253 = sbr.rel (%p2111_p8) target bundleno = 571 (0x23b), region = 40 }
  0x2f   : > { %1669 = dma.hbm_to_vmem [thread:$0]  (!%p2168_p10), %s240_s6, 1024, %s242_s30, %s230_s12, %s2828_s10, %s2828_s10, %s2036_s9  }
  0x30   : > { %s2188_s28 = sand.u32 (!%p2111_p8), 1, %s2019_s19  }
  0x31   : > { %s1398_s13 = sshll.u32 (!%p2111_p8), %s2188_s28, 6  ;;  %s256_s8 = scalar_lea.sflag (!%p2111_p8), [#allocation3], %s2188_s28 }
  0x32   : > { %s2192_s17 = scalar_lea.vmem (!%p2111_p8), [#allocation2], %s1398_s13 }
  0x33   : > { %1998 = dma.done.wait (%p2098_p4), %s256_s8, 1024  }
  0x34   : > { %2000 = vsyncadd (%p2098_p4), %s256_s8, 4294966272 }
  0x35   : > { %2002 = dma.done.wait (%p44_p1), [#allocation6], 64  }
  0x36   : > { %2004 = vsyncadd (%p44_p1), [#allocation6], 4294967232 }
  0x37   : > { %2006 = dma.done.wait (%p44_p1), [#allocation9], 4096  }
  0x38   : > { %2008 = vsyncadd (%p44_p1), [#allocation9], 4294963200  ;;  %v1560_v0 = vld [vmem:[#allocation8 + $0x38] sm:$0xff]  ;;  %v1559_v2 = vld [vmem:[#allocation8 + $0x30] sm:$0xff]  ;;  %v2037_v6 = vmov 64.0   ;;  %vm440_vm7 = vcmask 1040384  }
  0x39   : > { %v1568_v1 = vld [vmem:[#allocation8 + $0x78] sm:$0xff]  ;;  %631 = vmatpush.bf16.msra.mxu0 %v1560_v0  ;;  %v1567_v3 = vld [vmem:[#allocation8 + $0x70] sm:$0xff]  ;;  %v308_v5 = vld [vmem:[%s2192_s17 + $0x8] sm:$0xff]  ;;  %1725 = vrcp.f32 %v2037_v6  ;;  %s1403_s24 = sshll.u32 %s2188_s28, 1  ;;  %s1549_s29 = sshll.u32 %s2089_s22, 1 }
  0x3a   : > { %660 = vmatpush.bf16.msra.mxu1 %v1568_v1  ;;  %v307_v4 = vld [vmem:[%s2192_s17] sm:$0xff]  ;;  %v1558_v7 = vld [vmem:[#allocation8 + $0x28] sm:$0xff]  ;;  %v2213_v12 = vunpack.c.l.bf16 %v308_v5  ;;  %v2215_v13 = vunpack.c.h.bf16 %v308_v5  ;;  %v310_v14 = vld [vmem:[%s2192_s17 + $0x18] sm:$0xff]  ;;  %s1274_s6 = scalar_lea.hbm %s2820_s5, %s1549_s29  ;;  %s306_s22 = scalar_lea.vmem [#allocation11], %s1403_s24 }
  0x3b   : > { %v1566_v8 = vld [vmem:[#allocation8 + $0x68] sm:$0xff]  ;;  %v2209_v10 = vunpack.c.l.bf16 %v307_v4  ;;  %v2211_v11 = vunpack.c.h.bf16 %v307_v4  ;;  %v311_v17 = vld [vmem:[%s2192_s17 + $0x20] sm:$0xff]  ;;  %v2223_v20 = vunpack.c.l.bf16 %v310_v14  ;;  %v2225_v21 = vunpack.c.h.bf16 %v310_v14  ;;  %v314_v41 = vld [vmem:[%s2192_s17 + $0x38] sm:$0xff]  ;;  %s1276_s7 = sshll.u32 %s306_s22, 4  ;;  %s1278_s12 = sshll.u32 %s1274_s6, 4  ;;  %s1277_s7 = int_to_ptr.vmem [resolvable:$true] %s1276_s7  ;;  %s1279_s12 = int_to_ptr.hbm [resolvable:$true] %s1278_s12 }
  0x3c   : > { %v309_v9 = vld [vmem:[%s2192_s17 + $0x10] sm:$0xff]  ;;  %v1557_v18 = vld [vmem:[#allocation8 + $0x20] sm:$0xff]  ;;  %v2234_v26 = vunpack.c.l.bf16 %v311_v17  ;;  %v2236_v27 = vunpack.c.h.bf16 %v311_v17  ;;  %v368_v33 = vmul.f32 %v2213_v12, %v2213_v12  ;;  %v369_v34 = vmul.f32 %v2215_v13, %v2215_v13  ;;  %v1556_v35 = vld [vmem:[#allocation8 + $0x18] sm:$0xff]  ;;  %s1264_s16 = scalar_lea.sflag [#allocation4], %s2188_s28  ;;  %s1967_s23 = sshra.s32 %s1279_s12, 4  ;;  %s1968_s23 = int_to_ptr.hbm [resolvable:$true] %s1967_s23 }
  0x3d   : > { %632 = vmatpush.bf16.msra.mxu0 %v1559_v2  ;;  %v2218_v15 = vunpack.c.l.bf16 %v309_v9  ;;  %v2220_v16 = vunpack.c.h.bf16 %v309_v9  ;;  %v1565_v19 = vld [vmem:[#allocation8 + $0x60] sm:$0xff]  ;;  %v331_v22 = vadd.f32 %v2213_v12, %v2209_v10  ;;  %v344_v23 = vadd.f32 %v2215_v13, %v2211_v11  ;;  %v313_v30 = vld [vmem:[%s2192_s17 + $0x30] sm:$0xff]  ;;  %v1564_v36 = vld [vmem:[#allocation8 + $0x58] sm:$0xff]  ;;  %s1969_s26 = scalar_lea.hbm %s1968_s23, 2  ;;  %s1973_s13 = scalar_lea.hbm %s2820_s5, 4 }
  0x3e   : > { %661 = vmatpush.bf16.msra.mxu1 %v1567_v3  ;;  %v312_v25 = vld [vmem:[%s2192_s17 + $0x28] sm:$0xff]  ;;  %v366_v31 = vmul.f32 %v2209_v10, %v2209_v10  ;;  %v367_v32 = vmul.f32 %v2211_v11, %v2211_v11  ;;  %v2261_v45 = vunpack.c.l.bf16 %v313_v30  ;;  %v2263_v46 = vunpack.c.h.bf16 %v313_v30  ;;  %v1555_v53 = vld [vmem:[#allocation8 + $0x10] sm:$0xff]  ;;  %p1970_p1 = scmp.ne.s32.totalorder %s1968_s23, %s1969_s26  ;;  %p1974_p9 = scmp.lt.s32.totalorder %s1968_s23, %s2820_s5 }
  0x3f   : > { %v2231_v24 = vpop.eup %1725  ;;  %v332_v28 = vadd.f32 %v331_v22, %v2218_v15  ;;  %v345_v29 = vadd.f32 %v344_v23, %v2220_v16  ;;  %v2249_v37 = vunpack.c.l.bf16 %v312_v25  ;;  %v2251_v38 = vunpack.c.h.bf16 %v312_v25  ;;  %v1563_v54 = vld [vmem:[#allocation8 + $0x50] sm:$0xff]  ;;  %v1554_v5 = vld [vmem:[#allocation8 + $0x8] sm:$0xff]  ;;  %p1975_p10 = scmp.lt.s32.totalorder %s1973_s13, %s1969_s26 }
  0x40   : > { %v358_v42 = vmul.f32 64.0, %v2231_v24  ;;  %v370_v43 = vmul.f32 %v2218_v15, %v2218_v15  ;;  %v371_v44 = vmul.f32 %v2220_v16, %v2220_v16  ;;  %v372_v49 = vmul.f32 %v2223_v20, %v2223_v20  ;;  %v1562_v6 = vld [vmem:[#allocation8 + $0x48] sm:$0xff]  ;;  %p1971_p4 = pnand %p1970_p1, %p2158_p5 }
  0x41   : > { %633 = vmatpush.bf16.msra.mxu0 %v1558_v7  ;;  %v333_v39 = vadd.f32 %v332_v28, %v2223_v20  ;;  %v346_v40 = vadd.f32 %v345_v29, %v2225_v21  ;;  %v373_v50 = vmul.f32 %v2225_v21, %v2225_v21  ;;  %v382_v51 = vadd.f32 %v368_v33, %v366_v31  ;;  %v1553_v31 = vld [vmem:[#allocation8] sm:$0xff]  ;;  %p1976_p2 = por %p1975_p10, %p1974_p9 }
  0x42   : > { %662 = vmatpush.bf16.msra.mxu1 %v1566_v8  ;;  %v395_v52 = vadd.f32 %v369_v34, %v367_v32  ;;  %v2271_v55 = vunpack.c.l.bf16 %v314_v41  ;;  %v2273_v56 = vunpack.c.h.bf16 %v314_v41  ;;  %v374_v59 = vmul.f32 %v2234_v26, %v2234_v26  ;;  %v1561_v32 = vld [vmem:[#allocation8 + $0x40] sm:$0xff]  ;;  %p1972_p8 = pneg %p1971_p4 }
  0x43   : > { %v334_v47 = vadd.f32 %v333_v39, %v2234_v26  ;;  %v347_v48 = vadd.f32 %v346_v40, %v2236_v27  ;;  %v375_v60 = vmul.f32 %v2236_v27, %v2236_v27  ;;  %v383_v61 = vadd.f32 %v382_v51, %v370_v43 }
  0x44   : > { %v396_v62 = vadd.f32 %v395_v52, %v371_v44  ;;  %v376_v1 = vmul.f32 %v2249_v37, %v2249_v37  ;;  %v377_v2 = vmul.f32 %v2251_v38, %v2251_v38  ;;  %v359_v9 = vsub.f32 1.0, %v358_v42  ;;  %p1977_p11 = pnand %p1976_p2, %p1972_p8 }
  0x45   : > { %634 = vmatpush.bf16.msra.mxu0 %v1557_v18  ;;  %v335_v57 = vadd.f32 %v334_v47, %v2249_v37  ;;  %v348_v58 = vadd.f32 %v347_v48, %v2251_v38  ;;  %v384_v3 = vadd.f32 %v383_v61, %v372_v49  ;;  %v378_v14 = vmul.f32 %v2261_v45, %v2261_v45 }
  0x46   : > { %663 = vmatpush.bf16.msra.mxu1 %v1565_v19  ;;  %v397_v4 = vadd.f32 %v396_v62, %v373_v50  ;;  %v379_v17 = vmul.f32 %v2263_v46, %v2263_v46  ;;  %v380_v25 = vmul.f32 %v2271_v55, %v2271_v55  ;;  %v381_v28 = vmul.f32 %v2273_v56, %v2273_v56 }
  0x47   : > { %v336_v63 = vadd.f32 %v335_v57, %v2261_v45  ;;  %v349_v0 = vadd.f32 %v348_v58, %v2263_v46  ;;  %v385_v18 = vadd.f32 %v384_v3, %v374_v59  ;;  %vm362_vm0 = vweird.f32 %v2231_v24 }
  0x48   : > { %v398_v19 = vadd.f32 %v397_v4, %v375_v60 }
  0x49   : > { %635 = vmatpush.bf16.msra.mxu0 %v1556_v35  ;;  %v337_v7 = vadd.f32 %v336_v63, %v2271_v55  ;;  %v350_v8 = vadd.f32 %v349_v0, %v2273_v56  ;;  %v386_v29 = vadd.f32 %v385_v18, %v376_v1  ;;  %v360_v35 = vmul.f32 %v2231_v24, %v359_v9 }
  0x4a   : > { %664 = vmatpush.bf16.msra.mxu1 %v1564_v36  ;;  %v399_v30 = vadd.f32 %v398_v19, %v377_v2 }
  0x4b   : > { %v338_v22 = vrot.slane %v337_v7, 4  ;;  %v351_v23 = vrot.slane %v350_v8, 4  ;;  %v387_v36 = vadd.f32 %v386_v29, %v378_v14  ;;  %v361_v48 = vadd.f32 %v2231_v24, %v360_v35 }
  0x4c   : > { %v400_v39 = vadd.f32 %v399_v30, %v379_v17 }
  0x4d   : > { %636 = vmatpush.bf16.msra.mxu0 %v1555_v53  ;;  %v339_v33 = vadd.f32 %v338_v22, %v337_v7  ;;  %v352_v34 = vadd.f32 %v351_v23, %v350_v8  ;;  %v388_v42 = vadd.f32 %v387_v36, %v380_v25  ;;  %v2301_v59 = vsel %vm362_vm0, %v2231_v24, %v361_v48 }
  0x4e   : > { %665 = vmatpush.bf16.msra.mxu1 %v1563_v54  ;;  %v401_v43 = vadd.f32 %v400_v39, %v381_v28 }
  0x4f   : > { %v340_v40 = vrot.slane %v339_v33, 2  ;;  %v353_v41 = vrot.slane %v352_v34, 2  ;;  %v389_v49 = vrot.slane %v388_v42, 4 }
  0x50   : > { %v402_v50 = vrot.slane %v401_v43, 4 }
  0x51   : > { %637 = vmatpush.bf16.msra.mxu0 %v1554_v5  ;;  %v341_v44 = vadd.f32 %v340_v40, %v339_v33  ;;  %v354_v47 = vadd.f32 %v353_v41, %v352_v34  ;;  %v390_v53 = vadd.f32 %v389_v49, %v388_v42  ;;  %v414_v40 = vld [vmem:[#allocation5] sm:$0x3] }
  0x52   : > { %666 = vmatpush.bf16.msra.mxu1 %v1562_v6  ;;  %v403_v54 = vadd.f32 %v402_v50, %v401_v43  ;;  %v444_v50 = vld [vmem:[#allocation7] sm:$0x3] }
  0x53   : > { %v342_v51 = vrot.slane %v341_v44, 1  ;;  %v355_v52 = vrot.slane %v354_v47, 1  ;;  %v391_v60 = vrot.slane %v390_v53, 2 }
  0x54   : > { %v404_v61 = vrot.slane %v403_v54, 2 }
  0x55   : > { %638 = vmatpush.bf16.msra.mxu0 %v1553_v31  ;;  %v343_v57 = vadd.f32 %v342_v51, %v341_v44  ;;  %v356_v58 = vadd.f32 %v355_v52, %v354_v47  ;;  %v392_v0 = vadd.f32 %v391_v60, %v390_v53 }
  0x56   : > { %667 = vmatpush.bf16.msra.mxu1 %v1561_v32  ;;  %v405_v1 = vadd.f32 %v404_v61, %v403_v54 }
  0x57   : > { %v364_v62 = vmul.f32 %v2301_v59, %v343_v57  ;;  %v365_v63 = vmul.f32 %v2301_v59, %v356_v58  ;;  %v393_v2 = vrot.slane %v392_v0, 1 }
  0x58   : > { %v406_v3 = vrot.slane %v405_v1, 1 }
  0x59   : > { %v394_v4 = vadd.f32 %v393_v2, %v392_v0  ;;  %v410_v6 = vmul.f32 %v364_v62, %v364_v62  ;;  %v411_v7 = vmul.f32 %v365_v63, %v365_v63 }
  0x5a   : > { %v407_v5 = vadd.f32 %v406_v3, %v405_v1 }
  0x5b   : > { %v408_v8 = vmul.f32 %v394_v4, %v2301_v59 }
  0x5c   : > { %v409_v9 = vmul.f32 %v407_v5, %v2301_v59 }
  0x5d   : > { %v412_v24 = vsub.f32 %v408_v8, %v410_v6  ;;  %v1584_v8 = vld [vmem:[#allocation10 + $0x74] sm:$0xf0] }
  0x5e   : > { %v413_v14 = vsub.f32 %v409_v9, %v411_v7  ;;  %v1583_v9 = vld [vmem:[#allocation10 + $0x74] sm:$0xf] }
  0x5f   : > { %v415_v17 = vadd.f32 1e-05, %v412_v24 }
  0x60   : > { %v416_v18 = vadd.f32 1e-05, %v413_v14  ;;  %v1528_v14 = vld [vmem:[#allocation10 + $0x78] sm:$0xf0] }
  0x61   : > { %1727 = vrsqrt.f32 %v415_v17  ;;  %vm423_vm1 = vweird.f32 %v415_v17 }
  0x62   : > { %1729 = vrsqrt.f32 %v416_v18  ;;  %vm433_vm3 = vweird.f32 %v416_v18 }
  0x67   : > { %v1728_v19 = vpop.eup %1727 }
  0x68   : > { %v1730_v22 = vpop.eup %1729  ;;  %v418_v23 = vmul.f32 %v1728_v19, %v415_v17  ;;  %vm424_vm2 = vweird.f32 %v1728_v19  ;;  %v1518_v17 = vld [vmem:[#allocation10 + $0x60] sm:$0xf] }
  0x69   : > { %v428_v25 = vmul.f32 %v1730_v22, %v416_v18  ;;  %vm434_vm4 = vweird.f32 %v1730_v22  ;;  %vm425_vm5 = vmor %vm423_vm1, %vm424_vm2  ;;  %v1582_v18 = vld [vmem:[#allocation10 + $0x64] sm:$0xf0] }
  0x6a   : > { %v419_v28 = vmul.f32 %v1728_v19, %v418_v23  ;;  %vm435_vm6 = vmor %vm433_vm3, %vm434_vm4  ;;  %v1520_v23 = vld [vmem:[#allocation10 + $0x68] sm:$0xf0] }
  0x6b   : > { %v429_v29 = vmul.f32 %v1730_v22, %v428_v25 }
  0x6c   : > { %v420_v30 = vmul.f32 0.5, %v419_v28  ;;  %v1519_v28 = vor.u32 %v1582_v18, %v1518_v17  ;;  %v1480_v17 = vld [vmem:[#allocation10 + $0x18] sm:$0xf0] }
  0x6d   : > { %v430_v31 = vmul.f32 0.5, %v429_v29 }
  0x6e   : > { %v421_v32 = vsub.f32 1.5, %v420_v30 }
  0x6f   : > { %v431_v33 = vsub.f32 1.5, %v430_v31 }
  0x70   : > { %v422_v34 = vmul.f32 %v1728_v19, %v421_v32 }
  0x71   : > { %v432_v35 = vmul.f32 %v1730_v22, %v431_v33  ;;  %v1510_v33 = vld [vmem:[#allocation10 + $0x50] sm:$0xf] }
  0x72   : > { %v426_v36 = vsel %vm425_vm5, %v1728_v19, %v422_v34  ;;  %v1531_v19 = vor.u32 %v1583_v9, %v1528_v14  ;;  %v1580_v34 = vld [vmem:[#allocation10 + $0x54] sm:$0xf0] }
  0x73   : > { %v436_v39 = vsel %vm435_vm6, %v1730_v22, %v432_v35  ;;  %v1581_v22 = vld [vmem:[#allocation10 + $0x64] sm:$0xf]  ;;  %v1579_v35 = vld [vmem:[#allocation10 + $0x54] sm:$0xf]  ;;  %v1572_v9 = vld [vmem:[#allocation10 + $0x14] sm:$0xf0] }
  0x74   : > { %v439_v41 = vrot.slane %v436_v39, 7  ;;  %826 = vmatpush.bf16.msra.mxu3 %v1531_v19  ;;  %v1523_v32 = vor.u32 %v1581_v22, %v1520_v23  ;;  %v1470_v19 = vld [vmem:[#allocation10] sm:$0xf]  ;;  %v1570_v22 = vld [vmem:[#allocation10 + $0x4] sm:$0xf0] }
  0x75   : > { %v1569_v23 = vld [vmem:[#allocation10 + $0x4] sm:$0xf] }
  0x76   : > { %v441_v42 = vsel %vm440_vm7, %v426_v36, %v439_v41  ;;  %v1512_v36 = vld [vmem:[#allocation10 + $0x58] sm:$0xf0]  ;;  %v1502_v41 = vld [vmem:[#allocation10 + $0x40] sm:$0xf] }
  0x77   : > { %v443_v43 = vmul.f32 %v441_v42, %v414_v40  ;;  %v1578_v42 = vld [vmem:[#allocation10 + $0x44] sm:$0xf0] }
  0x78   : > { %827 = vmatpush.bf16.msra.mxu3 %v1523_v32 }
  0x79   : > { %v2308_v44 = vperm.slane %v443_v43, 0  ;;  %v2310_v47 = vperm.slane %v443_v43, 1  ;;  %v1577_v43 = vld [vmem:[#allocation10 + $0x44] sm:$0xf] }
  0x7b   : > { %v450_v48 = vmul.f32 %v2308_v44, %v364_v62  ;;  %v451_v49 = vmul.f32 %v2310_v47, %v365_v63  ;;  %v458_v53 = vmul.f32 %v2308_v44, %v2209_v10  ;;  %v460_v57 = vmul.f32 %v2308_v44, %v2213_v12 }
  0x7c   : > { %v459_v58 = vmul.f32 %v2310_v47, %v2211_v11  ;;  %v461_v60 = vmul.f32 %v2310_v47, %v2215_v13  ;;  %v462_v1 = vmul.f32 %v2308_v44, %v2218_v15  ;;  %v464_v2 = vmul.f32 %v2308_v44, %v2223_v20 }
  0x7d   : > { %v454_v51 = vrot.slane %v451_v49, 7  ;;  %v463_v3 = vmul.f32 %v2310_v47, %v2220_v16  ;;  %v465_v4 = vmul.f32 %v2310_v47, %v2225_v21  ;;  %v1526_v21 = vld [vmem:[#allocation10 + $0x70] sm:$0xf]  ;;  %v466_v25 = vmul.f32 %v2308_v44, %v2234_v26 }
  0x7e   : > { %v1527_v24 = vor.u32 %v1584_v8, %v1526_v21  ;;  %v468_v29 = vmul.f32 %v2308_v44, %v2249_v37  ;;  %v467_v30 = vmul.f32 %v2310_v47, %v2236_v27  ;;  %v469_v31 = vmul.f32 %v2310_v47, %v2251_v38  ;;  %v1478_v8 = vld [vmem:[#allocation10 + $0x10] sm:$0xf] }
  0x7f   : > { %v455_v52 = vsel %vm440_vm7, %v450_v48, %v454_v51  ;;  %v1511_v26 = vor.u32 %v1580_v34, %v1510_v33  ;;  %v1515_v38 = vor.u32 %v1579_v35, %v1512_v36  ;;  %v1504_v48 = vld [vmem:[#allocation10 + $0x48] sm:$0xf0]  ;;  %v1503_v49 = vor.u32 %v1578_v42, %v1502_v41 }
  0x80   : > { %v457_v54 = vsub.f32 %v444_v50, %v455_v52  ;;  %797 = vmatpush.bf16.msra.mxu2 %v1527_v24  ;;  %v1507_v52 = vor.u32 %v1577_v43, %v1504_v48  ;;  %v1571_v24 = vld [vmem:[#allocation10 + $0x14] sm:$0xf]  ;;  %v1479_v14 = vor.u32 %v1572_v9, %v1478_v8 }
  0x81   : > { %828 = vmatpush.bf16.msra.mxu3 %v1515_v38  ;;  %v1483_v18 = vor.u32 %v1571_v24, %v1480_v17 }
  0x82   : > { %v2323_v61 = vperm.slane %v457_v54, 0  ;;  %v2325_v62 = vperm.slane %v457_v54, 1  ;;  %v472_v54 = vmul.f32 %v2308_v44, %v2271_v55 }
  0x84   : > { %v2328_v63 = vadd.f32 %v2323_v61, %v458_v53  ;;  %v2331_v0 = vadd.f32 %v2323_v61, %v460_v57  ;;  %v2334_v10 = vadd.f32 %v2325_v62, %v459_v58  ;;  %v2337_v12 = vadd.f32 %v2325_v62, %v461_v60  ;;  %798 = vmatpush.bf16.msra.mxu2 %v1519_v28  ;;  %v1472_v28 = vld [vmem:[#allocation10 + $0x8] sm:$0xf0] }
  0x85   : > { %v2352_v5 = vadd.f32 %v2323_v61, %v462_v1  ;;  %v2355_v6 = vadd.f32 %v2323_v61, %v464_v2  ;;  %v2358_v7 = vadd.f32 %v2325_v62, %v463_v3  ;;  %v2361_v15 = vadd.f32 %v2325_v62, %v465_v4  ;;  %829 = vmatpush.bf16.msra.mxu3 %v1507_v52  ;;  %v1486_v3 = vld [vmem:[#allocation10 + $0x20] sm:$0xf]  ;;  %v1574_v4 = vld [vmem:[#allocation10 + $0x24] sm:$0xf0] }
  0x86   : > { %v495_v11 = vpack.c.bf16 %v2331_v0, %v2328_v63  ;;  %v496_v13 = vpack.c.bf16 %v2337_v12, %v2334_v10  ;;  %v2376_v39 = vadd.f32 %v2323_v61, %v466_v25  ;;  %v2379_v40 = vadd.f32 %v2323_v61, %v468_v29 }
  0x87   : > { %v497_v20 = vpack.c.bf16 %v2355_v6, %v2352_v5  ;;  %v498_v16 = vpack.c.bf16 %v2361_v15, %v2358_v7  ;;  %v2382_v37 = vadd.f32 %v2325_v62, %v467_v30  ;;  %v2385_v27 = vadd.f32 %v2325_v62, %v469_v31 }
  0x88   : > { %639 = vmatmul.bf16.vlgmr.msra.gmra.mxu0 %v495_v11  ;;  %668 = vmatmul.bf16.vlgmr.msra.gmra.mxu1 %v496_v13  ;;  %v499_v50 = vpack.c.bf16 %v2379_v40, %v2376_v39  ;;  %v470_v53 = vmul.f32 %v2308_v44, %v2261_v45  ;;  %v471_v57 = vmul.f32 %v2310_v47, %v2263_v46  ;;  %v1576_v44 = vld [vmem:[#allocation10 + $0x34] sm:$0xf0] }
  0x89   : > { %799 = vmatpush.bf16.msra.mxu2 %v1511_v26  ;;  %v500_v51 = vpack.c.bf16 %v2385_v27, %v2382_v37  ;;  %v473_v58 = vmul.f32 %v2310_v47, %v2273_v56  ;;  %v2403_v11 = vadd.f32 %v2323_v61, %v472_v54  ;;  %v1494_v56 = vld [vmem:[#allocation10 + $0x30] sm:$0xf]  ;;  %v1575_v47 = vld [vmem:[#allocation10 + $0x34] sm:$0xf]  ;;  %v1471_v25 = vor.u32 %v1570_v22, %v1470_v19 }
  0x8a   : > { %v2400_v60 = vadd.f32 %v2323_v61, %v470_v53  ;;  %v2406_v13 = vadd.f32 %v2325_v62, %v471_v57  ;;  %v1495_v1 = vor.u32 %v1576_v44, %v1494_v56  ;;  %v1496_v61 = vld [vmem:[#allocation10 + $0x38] sm:$0xf0]  ;;  %v1475_v29 = vor.u32 %v1569_v23, %v1472_v28 }
  0x8b   : > { %v2409_v45 = vadd.f32 %v2325_v62, %v473_v58  ;;  %v1499_v2 = vor.u32 %v1575_v47, %v1496_v61  ;;  %v1573_v62 = vld [vmem:[#allocation10 + $0x24] sm:$0xf] }
  0x8c   : > { %v501_v55 = vpack.c.bf16 %v2403_v11, %v2400_v60 }
  0x8d   : > { %800 = vmatpush.bf16.msra.mxu2 %v1503_v49  ;;  %v502_v46 = vpack.c.bf16 %v2409_v45, %v2406_v13  ;;  %830 = vmatpush.bf16.msra.mxu3 %v1499_v2 }
  0x91   : > { %801 = vmatpush.bf16.msra.mxu2 %v1495_v1 }
  0x98   : > { %644 = vmatmul.bf16.gmra.mxu0 %v497_v20  ;;  %673 = vmatmul.bf16.gmra.mxu1 %v498_v16  ;;  %v1487_v20 = vor.u32 %v1574_v4, %v1486_v3  ;;  %v1488_v16 = vld [vmem:[#allocation10 + $0x28] sm:$0xf0] }
  0x99   : > { %v1491_v21 = vor.u32 %v1573_v62, %v1488_v16 }
  0x9a   : > { %802 = vmatpush.bf16.msra.mxu2 %v1487_v20 }
  0x9b   : > { %831 = vmatpush.bf16.msra.mxu3 %v1491_v21 }
  0x9e   : > { %803 = vmatpush.bf16.msra.mxu2 %v1479_v14 }
  0x9f   : > { %832 = vmatpush.bf16.msra.mxu3 %v1483_v18 }
  0xa2   : > { %804 = vmatpush.bf16.msra.mxu2 %v1471_v25 }
  0xa3   : > { %833 = vmatpush.bf16.msra.mxu3 %v1475_v29 }
  0xa8   : > { %649 = vmatmul.bf16.gmra.mxu0 %v499_v50  ;;  %678 = vmatmul.bf16.gmra.mxu1 %v500_v51 }
  0xb8   : > { %654 = vmatmul.bf16.gmra.mxu0 %v501_v55  ;;  %683 = vmatmul.bf16.gmra.mxu1 %v502_v46 }
 0x105   : > { %v640_v30 = vpop.f32.mrf.mxu0  ;;  %v669_v31 = vpop.f32.mrf.mxu1 }
 0x106   : > { %v670_v32 = vadd.f32 %v669_v31, %v640_v30 }
 0x108   : > { %v689_v36 = vmax.f32 %v670_v32, 0.0 }
 0x10d   : > { %v642_v33 = vpop.f32.mrf.mxu0  ;;  %v671_v34 = vpop.f32.mrf.mxu1 }
 0x10e   : > { %v672_v35 = vadd.f32 %v671_v34, %v642_v33 }
 0x110   : > { %v690_v26 = vmax.f32 %v672_v35, 0.0 }
 0x112   : > { %v697_v38 = vpack.c.bf16 %v690_v26, %v689_v36 }
 0x114   : > { %805 = vmatmul.bf16.vlgmr.msra.gmra.mxu2 %v697_v38  ;;  %834 = vmatmul.bf16.vlgmr.msra.gmra.mxu3 %v697_v38 }
 0x115   : > { %v645_v41 = vpop.f32.mrf.mxu0  ;;  %v674_v42 = vpop.f32.mrf.mxu1 }
 0x116   : > { %v675_v43 = vadd.f32 %v674_v42, %v645_v41 }
 0x118   : > { %v691_v51 = vmax.f32 %v675_v43, 0.0 }
 0x11d   : > { %v647_v48 = vpop.f32.mrf.mxu0  ;;  %v676_v49 = vpop.f32.mrf.mxu1 }
 0x11e   : > { %v677_v50 = vadd.f32 %v676_v49, %v647_v48 }
 0x120   : > { %v692_v52 = vmax.f32 %v677_v50, 0.0 }
 0x122   : > { %v698_v53 = vpack.c.bf16 %v692_v52, %v691_v51 }
 0x124   : > { %810 = vmatmul.bf16.gmra.mxu2 %v698_v53  ;;  %839 = vmatmul.bf16.gmra.mxu3 %v698_v53 }
 0x125   : > { %v650_v54 = vpop.f32.mrf.mxu0  ;;  %v679_v57 = vpop.f32.mrf.mxu1 }
 0x126   : > { %v680_v58 = vadd.f32 %v679_v57, %v650_v54 }
 0x128   : > { %v693_v44 = vmax.f32 %v680_v58, 0.0 }
 0x12d   : > { %v652_v55 = vpop.f32.mrf.mxu0  ;;  %v681_v46 = vpop.f32.mrf.mxu1 }
 0x12e   : > { %v682_v56 = vadd.f32 %v681_v46, %v652_v55 }
 0x130   : > { %v694_v47 = vmax.f32 %v682_v56, 0.0 }
 0x132   : > { %v699_v1 = vpack.c.bf16 %v694_v47, %v693_v44 }
 0x134   : > { %815 = vmatmul.bf16.gmra.mxu2 %v699_v1  ;;  %844 = vmatmul.bf16.gmra.mxu3 %v699_v1 }
 0x135   : > { %v655_v61 = vpop.f32.mrf.mxu0  ;;  %v684_v2 = vpop.f32.mrf.mxu1 }
 0x136   : > { %v685_v3 = vadd.f32 %v684_v2, %v655_v61 }
 0x138   : > { %v695_v16 = vmax.f32 %v685_v3, 0.0 }
 0x13d   : > { %v657_v4 = vpop.f32.mrf.mxu0  ;;  %v686_v62 = vpop.f32.mrf.mxu1 }
 0x13e   : > { %v687_v20 = vadd.f32 %v686_v62, %v657_v4 }
 0x140   : > { %v696_v21 = vmax.f32 %v687_v20, 0.0 }
 0x142   : > { %v700_v8 = vpack.c.bf16 %v696_v21, %v695_v16 }
 0x144   : > { %820 = vmatmul.bf16.gmra.mxu2 %v700_v8  ;;  %849 = vmatmul.bf16.gmra.mxu3 %v700_v8 }
 0x197   : > { %v806_v9 = vpop.f32.mrf.mxu2  ;;  %v835_v24 = vpop.f32.mrf.mxu3 }
 0x198   : > { %v1532_v14 = vmul.f32 -1.442695, %v806_v9  ;;  %v1533_v17 = vmul.f32 -1.442695, %v835_v24 }
 0x19a   : > { %1731 = vpow2.f32 %v1532_v14 }
 0x19b   : > { %1733 = vpow2.f32 %v1533_v17 }
 0x19f   : > { %v808_v18 = vpop.f32.mrf.mxu2  ;;  %v837_v19 = vpop.f32.mrf.mxu3 }
 0x1a0   : > { %v1732_v22 = vpop.eup %1731  ;;  %v1534_v23 = vmul.f32 -1.442695, %v808_v18  ;;  %v1535_v29 = vmul.f32 -1.442695, %v837_v19 }
 0x1a1   : > { %v1734_v25 = vpop.eup %1733  ;;  %v903_v28 = vadd.f32 1.0, %v1732_v22 }
 0x1a2   : > { %v2415_v30 = vadd.f32 1.0, %v1734_v25  ;;  %1735 = vpow2.f32 %v1534_v23 }
 0x1a3   : > { %1737 = vrcp.f32 %v903_v28  ;;  %vm924_vm8 = vweird.f32 %v903_v28  ;;  %v928_v61 = vand.u32 2147483647, %v903_v28  ;;  %v930_v2 = vand.u32 2147483648, %v903_v28 }
 0x1a4   : > { %1739 = vrcp.f32 %v2415_v30  ;;  %v943_v21 = vand.u32 2147483647, %v2415_v30  ;;  %v945_v8 = vand.u32 2147483648, %v2415_v30  ;;  %vm939_vm10 = vweird.f32 %v2415_v30 }
 0x1a5   : > { %1741 = vpow2.f32 %v1535_v29  ;;  %vm2462_vm12 = vcmp.eq.f32.partialorder %v928_v61, 8.507059e+37  ;;  %v931_v23 = vor.u32 1.1754944e-38, %v930_v2 }
 0x1a6   : > { %vm2475_vm15 = vcmp.eq.f32.partialorder %v943_v21, 8.507059e+37 }
 0x1a7   : > { %v811_v31 = vpop.f32.mrf.mxu2  ;;  %v840_v32 = vpop.f32.mrf.mxu3 }
 0x1a8   : > { %v1736_v33 = vpop.eup %1735  ;;  %v1536_v34 = vmul.f32 -1.442695, %v811_v31  ;;  %v1537_v26 = vmul.f32 -1.442695, %v840_v32 }
 0x1a9   : > { %v2418_v35 = vpop.eup %1737  ;;  %v2420_v36 = vadd.f32 1.0, %v1736_v33 }
 0x1aa   : > { %v2422_v38 = vpop.eup %1739  ;;  %v920_v41 = vmul.f32 %v2418_v35, %v903_v28  ;;  %1743 = vpow2.f32 %v1536_v34  ;;  %vm925_vm9 = vweird.f32 %v2418_v35  ;;  %v946_v34 = vor.u32 1.1754944e-38, %v945_v8 }
 0x1ab   : > { %v1742_v42 = vpop.eup %1741  ;;  %1745 = vrcp.f32 %v2420_v36  ;;  %v935_v48 = vmul.f32 %v2422_v38, %v2415_v30  ;;  %v958_v14 = vand.u32 2147483647, %v2420_v36  ;;  %v960_v17 = vand.u32 2147483648, %v2420_v36  ;;  %vm2458_vm11 = vmor %vm924_vm8, %vm925_vm9 }
 0x1ac   : > { %v2426_v43 = vadd.f32 1.0, %v1742_v42  ;;  %1747 = vpow2.f32 %v1537_v26  ;;  %v921_v49 = vsub.f32 1.0, %v920_v41  ;;  %vm940_vm13 = vweird.f32 %v2422_v38 }
 0x1ad   : > { %v936_v57 = vsub.f32 1.0, %v935_v48  ;;  %vm954_vm0 = vweird.f32 %v2420_v36  ;;  %vm2483_vm1 = vmor %vm939_vm10, %vm940_vm13  ;;  %vm2487_vm2 = vcmp.eq.f32.partialorder %v958_v14, 8.507059e+37  ;;  %v961_v42 = vor.u32 1.1754944e-38, %v960_v17 }
 0x1ae   : > { %1749 = vrcp.f32 %v2426_v43  ;;  %v922_v55 = vmul.f32 %v2418_v35, %v921_v49  ;;  %vm969_vm4 = vweird.f32 %v2426_v43 }
 0x1af   : > { %v813_v50 = vpop.f32.mrf.mxu2  ;;  %v842_v53 = vpop.f32.mrf.mxu3  ;;  %v937_v3 = vmul.f32 %v2422_v38, %v936_v57 }
 0x1b0   : > { %v1744_v51 = vpop.eup %1743  ;;  %v1538_v52 = vmul.f32 -1.442695, %v813_v50  ;;  %v1539_v44 = vmul.f32 -1.442695, %v842_v53  ;;  %v923_v62 = vadd.f32 %v2418_v35, %v922_v55 }
 0x1b1   : > { %v2431_v54 = vpop.eup %1745  ;;  %v2433_v58 = vadd.f32 1.0, %v1744_v51  ;;  %v938_v25 = vadd.f32 %v2422_v38, %v937_v3 }
 0x1b2   : > { %v950_v46 = vmul.f32 %v2431_v54, %v2420_v36  ;;  %1751 = vpow2.f32 %v1538_v52  ;;  %v1748_v56 = vpop.eup %1747  ;;  %v927_v29 = vsel %vm2458_vm11, %v2418_v35, %v923_v62  ;;  %vm955_vm14 = vweird.f32 %v2431_v54 }
 0x1b3   : > { %1753 = vrcp.f32 %v2433_v58  ;;  %v2447_v16 = vadd.f32 1.0, %v1748_v56  ;;  %v932_v36 = vsel %vm2462_vm12, %v931_v23, %v927_v29  ;;  %v942_v30 = vsel %vm2483_vm1, %v2422_v38, %v938_v25  ;;  %vm2500_vm3 = vmor %vm954_vm0, %vm955_vm14 }
 0x1b4   : > { %v2439_v47 = vpop.eup %1749  ;;  %v951_v1 = vsub.f32 1.0, %v950_v46  ;;  %1755 = vpow2.f32 %v1539_v44  ;;  %v973_v46 = vand.u32 2147483647, %v2426_v43  ;;  %v975_v44 = vand.u32 2147483648, %v2426_v43 }
 0x1b5   : > { %v965_v4 = vmul.f32 %v2439_v47, %v2426_v43  ;;  %1757 = vrcp.f32 %v2447_v16  ;;  %vm970_vm5 = vweird.f32 %v2439_v47  ;;  %v1159_v61 = vmul.f32 %v932_v36, %v2328_v63 }
 0x1b6   : > { %v952_v20 = vmul.f32 %v2431_v54, %v951_v1  ;;  %vm2530_vm8 = vmor %vm969_vm4, %vm970_vm5  ;;  %vm984_vm9 = vweird.f32 %v2433_v58  ;;  %v988_v63 = vand.u32 2147483647, %v2433_v58  ;;  %vm974_vm11 = vcmp.eq.f32.partialorder %v973_v46, 8.507059e+37 }
 0x1b7   : > { %v966_v9 = vsub.f32 1.0, %v965_v4  ;;  %v816_v32 = vpop.f32.mrf.mxu2  ;;  %v845_v50 = vpop.f32.mrf.mxu3  ;;  %v990_v4 = vand.u32 2147483648, %v2433_v58  ;;  %v1175_v17 = vmax.f32 %v1159_v61, 1e-06  ;;  %vm999_vm14 = vweird.f32 %v2447_v16 }
 0x1b8   : > { %v1752_v24 = vpop.eup %1751  ;;  %v953_v31 = vadd.f32 %v2431_v54, %v952_v20  ;;  %v1540_v53 = vmul.f32 -1.442695, %v816_v32  ;;  %v1541_v8 = vmul.f32 -1.442695, %v845_v50  ;;  %vm989_vm12 = vcmp.eq.f32.partialorder %v988_v63, 8.507059e+37 }
 0x1b9   : > { %v2455_v18 = vpop.eup %1753  ;;  %v967_v26 = vmul.f32 %v2439_v47, %v966_v9  ;;  %v2491_v49 = vadd.f32 1.0, %v1752_v24  ;;  %v976_v24 = vor.u32 1.1754944e-38, %v975_v44  ;;  %v1005_v36 = vand.u32 2147483648, %v2447_v16 }
 0x1ba   : > { %v980_v28 = vmul.f32 %v2455_v18, %v2433_v58  ;;  %v1756_v51 = vpop.eup %1755  ;;  %v957_v55 = vsel %vm2500_vm3, %v2431_v54, %v953_v31  ;;  %v947_v54 = vsel %vm2475_vm15, %v946_v34, %v942_v30  ;;  %vm985_vm6 = vweird.f32 %v2455_v18 }
 0x1bb   : > { %v2505_v57 = vpop.eup %1757  ;;  %1759 = vrcp.f32 %v2491_v49  ;;  %v968_v38 = vadd.f32 %v2439_v47, %v967_v26  ;;  %v962_v3 = vsel %vm2487_vm2, %v961_v42, %v957_v55  ;;  %v2526_v62 = vadd.f32 1.0, %v1756_v51  ;;  %vm2539_vm10 = vmor %vm984_vm9, %vm985_vm6 }
 0x1bc   : > { %v981_v48 = vsub.f32 1.0, %v980_v28  ;;  %v995_v1 = vmul.f32 %v2505_v57, %v2447_v16  ;;  %1761 = vpow2.f32 %v1540_v53  ;;  %v1160_v19 = vmul.f32 %v947_v54, %v2334_v10 }
 0x1bd   : > { %v972_v9 = vsel %vm2530_vm8, %v2439_v47, %v968_v38  ;;  %1763 = vrcp.f32 %v2526_v62  ;;  %v1161_v58 = vmul.f32 %v962_v3, %v2331_v0  ;;  %v991_v47 = vor.u32 1.1754944e-38, %v990_v4 }
 0x1be   : > { %v982_v56 = vmul.f32 %v2455_v18, %v981_v48  ;;  %v996_v21 = vsub.f32 1.0, %v995_v1  ;;  %v977_v25 = vsel %vm974_vm11, %v976_v24, %v972_v9  ;;  %1765 = vpow2.f32 %v1541_v8 }
 0x1bf   : > { %v818_v23 = vpop.f32.mrf.mxu2  ;;  %v847_v31 = vpop.f32.mrf.mxu3  ;;  %v1191_v0 = vmul.f32 %v1175_v17, %v1175_v17  ;;  %v1176_v34 = vmax.f32 %v1160_v19, 1e-06  ;;  %v1177_v26 = vmax.f32 %v1161_v58, 1e-06  ;;  %v1162_v41 = vmul.f32 %v977_v25, %v2337_v12 }
 0x1c0   : > { %v983_v2 = vadd.f32 %v2455_v18, %v982_v56  ;;  %v997_v29 = vmul.f32 %v2505_v57, %v996_v21  ;;  %v1542_v33 = vmul.f32 -1.442695, %v818_v23  ;;  %vm1000_vm13 = vweird.f32 %v2505_v57 }
 0x1c1   : > { %v2544_v43 = vpop.eup %1759  ;;  %v1543_v42 = vmul.f32 -1.442695, %v847_v31  ;;  %v1192_v12 = vmul.f32 %v1176_v34, %v1176_v34  ;;  %v1003_v53 = vand.u32 2147483647, %v2447_v16  ;;  %v1207_v46 = vmul.f32 %v1191_v0, %v1175_v17  ;;  %vm2570_vm15 = vmor %vm999_vm14, %vm1000_vm13 }
 0x1c2   : > { %v987_v22 = vsel %vm2539_vm10, %v2455_v18, %v983_v2  ;;  %v1762_v28 = vpop.eup %1761  ;;  %v1010_v10 = vmul.f32 %v2544_v43, %v2491_v49  ;;  %1767 = vpow2.f32 %v1542_v33  ;;  %v998_v50 = vadd.f32 %v2505_v57, %v997_v29 }
 0x1c3   : > { %v992_v32 = vsel %vm989_vm12, %v991_v47, %v987_v22  ;;  %v2554_v35 = vadd.f32 1.0, %v1762_v28  ;;  %v2556_v18 = vpop.eup %1763  ;;  %v1193_v38 = vmul.f32 %v1177_v26, %v1177_v26  ;;  %v1178_v44 = vmax.f32 %v1162_v41, 1e-06 }
 0x1c4   : > { %v1163_v48 = vmul.f32 %v992_v32, %v2352_v5  ;;  %v1025_v51 = vmul.f32 %v2556_v18, %v2526_v62  ;;  %v1011_v30 = vsub.f32 1.0, %v1010_v10  ;;  %v1766_v52 = vpop.eup %1765  ;;  %v1002_v61 = vsel %vm2570_vm15, %v2505_v57, %v998_v50 }
 0x1c5   : > { %1769 = vrcp.f32 %v2554_v35  ;;  %v2574_v56 = vadd.f32 1.0, %v1766_v52  ;;  %v1006_v2 = vor.u32 1.1754944e-38, %v1005_v36  ;;  %v1018_v4 = vand.u32 2147483647, %v2491_v49 }
 0x1c6   : > { %v1026_v55 = vsub.f32 1.0, %v1025_v51  ;;  %1771 = vpow2.f32 %v1543_v42  ;;  %v1179_v1 = vmax.f32 %v1163_v48, 1e-06  ;;  %v1012_v3 = vmul.f32 %v2544_v43, %v1011_v30 }
 0x1c7   : > { %v821_v54 = vpop.f32.mrf.mxu2  ;;  %1773 = vrcp.f32 %v2574_v56  ;;  %v1208_v63 = vmul.f32 %v1192_v12, %v1176_v34  ;;  %vm1004_vm0 = vcmp.eq.f32.partialorder %v1003_v53, 8.507059e+37  ;;  %vm1014_vm1 = vweird.f32 %v2491_v49  ;;  %v850_v25 = vpop.f32.mrf.mxu3 }
 0x1c8   : > { %v1768_v16 = vpop.eup %1767  ;;  %v1027_v21 = vmul.f32 %v2556_v18, %v1026_v55  ;;  %v1007_v9 = vsel %vm1004_vm0, %v1006_v2, %v1002_v61  ;;  %v1020_v57 = vand.u32 2147483648, %v2491_v49  ;;  %v1544_v24 = vmul.f32 -1.442695, %v821_v54 }
 0x1c9   : > { %v2585_v8 = vadd.f32 1.0, %v1768_v16  ;;  %v1209_v17 = vmul.f32 %v1193_v38, %v1177_v26  ;;  %v1194_v19 = vmul.f32 %v1178_v44, %v1178_v44  ;;  %v1195_v58 = vmul.f32 %v1179_v1, %v1179_v1 }
 0x1ca   : > { %v1013_v22 = vadd.f32 %v2544_v43, %v1012_v3  ;;  %vm1015_vm2 = vweird.f32 %v2544_v43  ;;  %vm2592_vm3 = vcmp.eq.f32.partialorder %v1018_v4, 8.507059e+37  ;;  %v1164_v29 = vmul.f32 %v1007_v9, %v2358_v7 }
 0x1cb   : > { %v2582_v20 = vpop.eup %1769  ;;  %1775 = vrcp.f32 %v2585_v8  ;;  %v1028_v31 = vadd.f32 %v2556_v18, %v1027_v21  ;;  %vm1030_vm4 = vweird.f32 %v2556_v18  ;;  %v1021_v10 = vor.u32 1.1754944e-38, %v1020_v57  ;;  %vm2611_vm6 = vmor %vm1014_vm1, %vm1015_vm2 }
 0x1cc   : > { %v1772_v14 = vpop.eup %1771  ;;  %v1040_v47 = vmul.f32 %v2582_v20, %v2554_v35  ;;  %vm1029_vm5 = vweird.f32 %v2526_v62  ;;  %v1035_v33 = vand.u32 2147483648, %v2526_v62  ;;  %1777 = vpow2.f32 %v1544_v24 }
 0x1cd   : > { %v2601_v28 = vadd.f32 1.0, %v1772_v14  ;;  %v2603_v32 = vpop.eup %1773  ;;  %v1210_v0 = vmul.f32 %v1194_v19, %v1178_v44  ;;  %v1211_v34 = vmul.f32 %v1195_v58, %v1179_v1  ;;  %v1033_v26 = vand.u32 2147483647, %v2526_v62  ;;  %vm2621_vm8 = vmor %vm1029_vm5, %vm1030_vm4 }
 0x1ce   : > { %v1055_v41 = vmul.f32 %v2603_v32, %v2574_v56  ;;  %v1017_v42 = vsel %vm2611_vm6, %v2544_v43, %v1013_v22  ;;  %v1041_v50 = vsub.f32 1.0, %v1040_v47  ;;  %v1545_v49 = vmul.f32 -1.442695, %v850_v25 }
 0x1cf   : > { %1779 = vrcp.f32 %v2601_v28  ;;  %v1223_v36 = vadd.f32 %v1209_v17, %v1207_v46  ;;  %v1180_v30 = vmax.f32 %v1164_v29, 1e-06  ;;  %v1032_v62 = vsel %vm2621_vm8, %v2556_v18, %v1028_v31  ;;  %v823_v46 = vpop.f32.mrf.mxu2  ;;  %v852_v24 = vpop.f32.mrf.mxu3 }
 0x1d0   : > { %v1056_v52 = vsub.f32 1.0, %v1055_v41  ;;  %v1036_v12 = vor.u32 1.1754944e-38, %v1035_v33  ;;  %v1048_v43 = vand.u32 2147483647, %v2554_v35  ;;  %v1050_v53 = vand.u32 2147483648, %v2554_v35 }
 0x1d1   : > { %v2626_v51 = vpop.eup %1775  ;;  %v2635_v5 = vadd.f32 %v1210_v0, %v1208_v63  ;;  %v1022_v38 = vsel %vm2592_vm3, %v1021_v10, %v1017_v42  ;;  %vm1034_vm9 = vcmp.eq.f32.partialorder %v1033_v26, 8.507059e+37  ;;  %vm1044_vm10 = vweird.f32 %v2554_v35 }
 0x1d2   : > { %v1070_v55 = vmul.f32 %v2626_v51, %v2585_v8  ;;  %v1778_v44 = vpop.eup %1777  ;;  %v2640_v18 = vadd.f32 %v1223_v36, %v1211_v34  ;;  %v1037_v1 = vsel %vm1034_vm9, %v1036_v12, %v1032_v62  ;;  %v1042_v61 = vmul.f32 %v2582_v20, %v1041_v50 }
 0x1d3   : > { %1781 = vpow2.f32 %v1545_v49  ;;  %v1196_v54 = vmul.f32 %v1180_v30, %v1180_v30  ;;  %v1057_v16 = vmul.f32 %v2603_v32, %v1056_v52  ;;  %v2644_v3 = vadd.f32 1.0, %v1778_v44 }
 0x1d4   : > { %v1071_v2 = vsub.f32 1.0, %v1070_v55  ;;  %v1165_v63 = vmul.f32 %v1022_v38, %v2355_v6  ;;  %vm2649_vm11 = vcmp.eq.f32.partialorder %v1048_v43, 8.507059e+37  ;;  %v1051_v9 = vor.u32 1.1754944e-38, %v1050_v53 }
 0x1d5   : > { %v2646_v4 = vpop.eup %1779  ;;  %v1546_v57 = vmul.f32 -1.442695, %v823_v46  ;;  %v1166_v14 = vmul.f32 %v1037_v1, %v2361_v15  ;;  %v1063_v17 = vand.u32 2147483647, %v2574_v56  ;;  %1783 = vrcp.f32 %v2644_v3 }
 0x1d6   : > { %v1085_v19 = vmul.f32 %v2646_v4, %v2601_v28  ;;  %v1043_v58 = vadd.f32 %v2582_v20, %v1042_v61  ;;  %vm1045_vm12 = vweird.f32 %v2582_v20  ;;  %vm1060_vm13 = vweird.f32 %v2603_v32 }
 0x1d7   : > { %v1065_v6 = vand.u32 2147483648, %v2574_v56  ;;  %v1058_v22 = vadd.f32 %v2603_v32, %v1057_v16  ;;  %v1072_v23 = vmul.f32 %v2626_v51, %v1071_v2  ;;  %v1547_v47 = vmul.f32 -1.442695, %v852_v24  ;;  %vm2673_vm15 = vmor %vm1044_vm10, %vm1045_vm12 }
 0x1d8   : > { %v1086_v15 = vsub.f32 1.0, %v1085_v19  ;;  %v2664_v29 = vmul.f32 %v1196_v54, %v1180_v30  ;;  %v2666_v31 = vmax.f32 %v1165_v63, 1e-06  ;;  %vm1059_vm14 = vweird.f32 %v2574_v56 }
 0x1d9   : > { %v1782_v25 = vpop.eup %1781  ;;  %1785 = vpow2.f32 %v1546_v57  ;;  %v2669_v10 = vmax.f32 %v1166_v14, 1e-06  ;;  %vm2677_vm0 = vcmp.eq.f32.partialorder %v1063_v17, 8.507059e+37  ;;  %v1078_v34 = vand.u32 2147483647, %v2585_v8  ;;  %vm2688_vm1 = vmor %vm1059_vm14, %vm1060_vm13 }
 0x1da   : > { %v1080_v7 = vand.u32 2147483648, %v2585_v8  ;;  %v1047_v56 = vsel %vm2673_vm15, %v2582_v20, %v1043_v58  ;;  %v1066_v26 = vor.u32 1.1754944e-38, %v1065_v6  ;;  %vm1075_vm2 = vweird.f32 %v2626_v51 }
 0x1db   : > { %v2693_v41 = vadd.f32 1.0, %v1782_v25  ;;  %v1784_v42 = vpop.eup %1783  ;;  %v1062_v48 = vsel %vm2688_vm1, %v2603_v32, %v1058_v22  ;;  %v1073_v50 = vadd.f32 %v2626_v51, %v1072_v23  ;;  %v1087_v20 = vmul.f32 %v2646_v4, %v1086_v15 }
 0x1dc   : > { %1787 = vpow2.f32 %v1547_v47  ;;  %v1197_v49 = vmul.f32 %v2666_v31, %v2666_v31  ;;  %vm1074_vm3 = vweird.f32 %v2585_v8  ;;  %v1100_v36 = vmul.f32 %v1784_v42, %v2644_v3 }
 0x1dd   : > { %1789 = vrcp.f32 %v2693_v41  ;;  %v1198_v30 = vmul.f32 %v2669_v10, %v2669_v10  ;;  %v1052_v32 = vsel %vm2649_vm11, %v1051_v9, %v1047_v56  ;;  %vm2709_vm4 = vcmp.eq.f32.partialorder %v1078_v34, 8.507059e+37  ;;  %vm2717_vm5 = vmor %vm1074_vm3, %vm1075_vm2 }
 0x1de   : > { %v1081_v52 = vor.u32 1.1754944e-38, %v1080_v7  ;;  %v1067_v43 = vsel %vm2677_vm0, %v1066_v26, %v1062_v48  ;;  %vm1090_vm6 = vweird.f32 %v2646_v4  ;;  %v1095_v53 = vand.u32 2147483648, %v2601_v28 }
 0x1df   : > { %v1786_v12 = vpop.eup %1785  ;;  %v1101_v55 = vsub.f32 1.0, %v1100_v36  ;;  %v1077_v38 = vsel %vm2717_vm5, %v2626_v51, %v1073_v50  ;;  %v1088_v46 = vadd.f32 %v2646_v4, %v1087_v20  ;;  %v1110_v44 = vand.u32 2147483648, %v2644_v3 }
 0x1e0   : > { %v2728_v1 = vadd.f32 1.0, %v1786_v12  ;;  %v1167_v61 = vmul.f32 %v1052_v32, %v2376_v39  ;;  %vm1105_vm8 = vweird.f32 %v1784_v42  ;;  %v1108_v16 = vand.u32 2147483647, %v2644_v3 }
 0x1e1   : > { %v1102_v54 = vmul.f32 %v1784_v42, %v1101_v55  ;;  %vm1089_vm9 = vweird.f32 %v2601_v28  ;;  %v1093_v63 = vand.u32 2147483647, %v2601_v28  ;;  %vm1104_vm10 = vweird.f32 %v2644_v3 }
 0x1e2   : > { %v1788_v2 = vpop.eup %1787  ;;  %1791 = vrcp.f32 %v2728_v1  ;;  %v1168_v21 = vmul.f32 %v1067_v43, %v2382_v37  ;;  %v1082_v9 = vsel %vm2709_vm4, %v1081_v52, %v1077_v38  ;;  %vm2741_vm11 = vmor %vm1089_vm9, %vm1090_vm6  ;;  %v1096_v3 = vor.u32 1.1754944e-38, %v1095_v53 }
 0x1e3   : > { %v1790_v51 = vpop.eup %1789  ;;  %v1103_v57 = vadd.f32 %v1784_v42, %v1102_v54  ;;  %v2745_v24 = vadd.f32 1.0, %v1788_v2  ;;  %v1092_v28 = vsel %vm2741_vm11, %v2646_v4, %v1088_v46  ;;  %vm1106_vm12 = vmor %vm1104_vm10, %vm1105_vm8  ;;  %v1111_v37 = vor.u32 1.1754944e-38, %v1110_v44 }
 0x1e4   : > { %v1115_v14 = vmul.f32 %v1790_v51, %v2693_v41  ;;  %v1183_v17 = vmax.f32 %v1167_v61, 1e-06  ;;  %vm1109_vm13 = vcmp.eq.f32.partialorder %v1108_v16, 8.507059e+37  ;;  %v1169_v58 = vmul.f32 %v1082_v9, %v2379_v40 }
 0x1e5   : > { %v1107_v19 = vsel %vm1106_vm12, %v1784_v42, %v1103_v57  ;;  %1793 = vrcp.f32 %v2745_v24  ;;  %vm1094_vm14 = vcmp.eq.f32.partialorder %v1093_v63, 8.507059e+37  ;;  %v2756_v23 = vadd.f32 %v2635_v5, %v2664_v29 }
 0x1e6   : > { %v1112_v6 = vsel %vm1109_vm13, %v1111_v37, %v1107_v19  ;;  %v1116_v22 = vsub.f32 1.0, %v1115_v14  ;;  %v1184_v4 = vmax.f32 %v1168_v21, 1e-06  ;;  %v1097_v15 = vsel %vm1094_vm14, %v1096_v3, %v1092_v28 }
 0x1e7   : > { %v1125_v47 = vand.u32 2147483648, %v2693_v41  ;;  %v1213_v33 = vmul.f32 %v1197_v49, %v2666_v31  ;;  %vm1120_vm15 = vweird.f32 %v1790_v51  ;;  %v1123_v34 = vand.u32 2147483647, %v2693_v41 }
 0x1e8   : > { %v1792_v25 = vpop.eup %1791  ;;  %v1117_v0 = vmul.f32 %v1790_v51, %v1116_v22  ;;  %v1214_v40 = vmul.f32 %v1198_v30, %v2669_v10  ;;  %v1199_v7 = vmul.f32 %v1183_v17, %v1183_v17  ;;  %v1171_v56 = vmul.f32 %v1112_v6, %v2400_v60 }
 0x1e9   : > { %v1130_v35 = vmul.f32 %v1792_v25, %v2728_v1  ;;  %v1185_v5 = vmax.f32 %v1169_v58, 1e-06  ;;  %v1170_v29 = vmul.f32 %v1097_v15, %v2385_v27  ;;  %vm1119_vm0 = vweird.f32 %v2693_v41 }
 0x1ea   : > { %v1118_v26 = vadd.f32 %v1790_v51, %v1117_v0  ;;  %v1200_v48 = vmul.f32 %v1184_v4, %v1184_v4  ;;  %vm1121_vm1 = vmor %vm1119_vm0, %vm1120_vm15  ;;  %v1126_v31 = vor.u32 1.1754944e-38, %v1125_v47  ;;  %v1140_v20 = vand.u32 2147483648, %v2728_v1 }
 0x1eb   : > { %v1794_v42 = vpop.eup %1793  ;;  %v1131_v50 = vsub.f32 1.0, %v1130_v35  ;;  %vm1124_vm2 = vcmp.eq.f32.partialorder %v1123_v34, 8.507059e+37  ;;  %v1138_v10 = vand.u32 2147483647, %v2728_v1  ;;  %v1187_v36 = vmax.f32 %v1171_v56, 1e-06 }
 0x1ec   : > { %v1122_v49 = vsel %vm1121_vm1, %v1790_v51, %v1118_v26  ;;  %v1145_v60 = vmul.f32 %v1794_v42, %v2745_v24  ;;  %vm1135_vm3 = vweird.f32 %v1792_v25  ;;  %v1201_v27 = vmul.f32 %v1185_v5, %v1185_v5 }
 0x1ed   : > { %v1127_v30 = vsel %vm1124_vm2, %v1126_v31, %v1122_v49  ;;  %v1132_v32 = vmul.f32 %v1792_v25, %v1131_v50  ;;  %v1186_v62 = vmax.f32 %v1170_v29, 1e-06  ;;  %vm1134_vm4 = vweird.f32 %v2728_v1 }
 0x1ee   : > { %v1172_v41 = vmul.f32 %v1127_v30, %v2406_v13  ;;  %v1146_v52 = vsub.f32 1.0, %v1145_v60  ;;  %v1141_v43 = vor.u32 1.1754944e-38, %v1140_v20  ;;  %v1155_v8 = vand.u32 2147483648, %v2745_v24  ;;  %vm1136_vm5 = vmor %vm1134_vm4, %vm1135_vm3 }
 0x1ef   : > { %v1133_v12 = vadd.f32 %v1792_v25, %v1132_v32  ;;  %vm1150_vm6 = vweird.f32 %v1794_v42  ;;  %v1153_v38 = vand.u32 2147483647, %v2745_v24  ;;  %v1215_v46 = vmul.f32 %v1199_v7, %v1183_v17 }
 0x1f0   : > { %v1188_v53 = vmax.f32 %v1172_v41, 1e-06  ;;  %v1147_v55 = vmul.f32 %v1794_v42, %v1146_v52  ;;  %v1203_v44 = vmul.f32 %v1187_v36, %v1187_v36  ;;  %vm1139_vm8 = vcmp.eq.f32.partialorder %v1138_v10, 8.507059e+37 }
 0x1f1   : > { %v1137_v61 = vsel %vm1136_vm5, %v1792_v25, %v1133_v12  ;;  %v1202_v54 = vmul.f32 %v1186_v62, %v1186_v62  ;;  %vm1149_vm9 = vweird.f32 %v2745_v24  ;;  %v1225_v1 = vadd.f32 %v2640_v18, %v1213_v33 }
 0x1f2   : > { %v1142_v16 = vsel %vm1139_vm8, %v1141_v43, %v1137_v61  ;;  %v1148_v13 = vadd.f32 %v1794_v42, %v1147_v55  ;;  %v1217_v2 = vmul.f32 %v1201_v27, %v1185_v5  ;;  %vm1151_vm10 = vmor %vm1149_vm9, %vm1150_vm6  ;;  %v1156_v51 = vor.u32 1.1754944e-38, %v1155_v8 }
 0x1f3   : > { %v1173_v63 = vmul.f32 %v1142_v16, %v2403_v11  ;;  %v1216_v21 = vmul.f32 %v1200_v48, %v1184_v4  ;;  %v1204_v9 = vmul.f32 %v1188_v53, %v1188_v53  ;;  %vm1154_vm11 = vcmp.eq.f32.partialorder %v1153_v38, 8.507059e+37 }
 0x1f4   : > { %v1152_v39 = vsel %vm1151_vm10, %v1794_v42, %v1148_v13  ;;  %v1226_v57 = vadd.f32 %v1225_v1, %v1215_v46  ;;  %v1219_v28 = vmul.f32 %v1203_v44, %v1187_v36  ;;  %v1238_v14 = vadd.f32 %v2756_v23, %v1214_v40 }
 0x1f5   : > { %v1189_v3 = vmax.f32 %v1173_v63, 1e-06  ;;  %v1157_v37 = vsel %vm1154_vm11, %v1156_v51, %v1152_v39  ;;  %v1218_v17 = vmul.f32 %v1202_v54, %v1186_v62  ;;  %v1220_v6 = vmul.f32 %v1204_v9, %v1188_v53 }
 0x1f6   : > { %v1174_v24 = vmul.f32 %v1157_v37, %v2409_v45  ;;  %v1227_v19 = vadd.f32 %v1226_v57, %v1217_v2  ;;  %v1239_v58 = vadd.f32 %v1238_v14, %v1216_v21 }
 0x1f7   : > { %v1205_v18 = vmul.f32 %v1189_v3, %v1189_v3 }
 0x1f8   : > { %v1190_v11 = vmax.f32 %v1174_v24, 1e-06  ;;  %v1228_v22 = vadd.f32 %v1227_v19, %v1219_v28  ;;  %v1240_v4 = vadd.f32 %v1239_v58, %v1218_v17  ;;  %v1258_v28 = vlaneseq }
 0x1f9   : > { %v1221_v15 = vmul.f32 %v1205_v18, %v1189_v3 }
 0x1fa   : > { %v1206_v47 = vmul.f32 %v1190_v11, %v1190_v11  ;;  %v1241_v33 = vadd.f32 %v1240_v4, %v1220_v6  ;;  %vm1260_vm6 = vcmp.lt.s32.totalorder %v1258_v28, 256 }
 0x1fb   : > { %v1229_v25 = vadd.f32 %v1228_v22, %v1221_v15 }
 0x1fc   : > { %v1222_v0 = vmul.f32 %v1206_v47, %v1190_v11 }
 0x1fd   : > { %v1230_v34 = vrot.slane %v1229_v25, 4 }
 0x1fe   : > { %v1242_v7 = vadd.f32 %v1241_v33, %v1222_v0 }
 0x1ff   : > { %v1231_v56 = vadd.f32 %v1230_v34, %v1229_v25 }
 0x200   : > { %v1243_v35 = vrot.slane %v1242_v7, 4 }
 0x201   : > { %v1232_v23 = vrot.slane %v1231_v56, 2 }
 0x202   : > { %v1244_v40 = vadd.f32 %v1243_v35, %v1242_v7 }
 0x203   : > { %v1233_v5 = vadd.f32 %v1232_v23, %v1231_v56 }
 0x204   : > { %v1245_v45 = vrot.slane %v1244_v40, 2 }
 0x205   : > { %v1234_v29 = vrot.slane %v1233_v5, 1 }
 0x206   : > { %v1246_v26 = vadd.f32 %v1245_v45, %v1244_v40 }
 0x207   : > { %v1235_v42 = vadd.f32 %v1234_v29, %v1233_v5 }
 0x208   : > { %v1247_v48 = vrot.slane %v1246_v26, 1 }
 0x209   : > { %v1249_v31 = vmul.f32 %v1235_v42, %v2301_v59 }
 0x20a   : > { %v1248_v50 = vadd.f32 %v1247_v48, %v1246_v26 }
 0x20b   : > { %v1587_v20 = vand.u32 2147483647, %v1249_v31  ;;  %v1604_v13 = vand.u32 2147483648, %v1249_v31  ;;  %vm1586_vm14 = vcmp.lt.f32.partialorder %v1249_v31, 0.0  ;;  %vm1585_vm2 = vcmp.eq.f32.partialorder %v1249_v31, 0.0 }
 0x20c   : > { %v1250_v49 = vmul.f32 %v1248_v50, %v2301_v59 }
 0x20d   : > { %1795 = vlog2.f32 %v1587_v20  ;;  %vm1601_vm12 = vweird.f32 %v1587_v20  ;;  %vm1603_vm13 = vcmp.eq.f32.partialorder %v1587_v20, 0.0  ;;  %vm1588_vm5 = vcmp.eq.f32.partialorder %v1587_v20, inf }
 0x20e   : > { %v1611_v10 = vand.u32 2147483647, %v1250_v49  ;;  %v1628_v21 = vand.u32 2147483648, %v1250_v49  ;;  %vm1610_vm1 = vcmp.lt.f32.partialorder %v1250_v49, 0.0  ;;  %vm1609_vm3 = vcmp.eq.f32.partialorder %v1250_v49, 0.0 }
 0x210   : > { %1797 = vlog2.f32 %v1611_v10  ;;  %vm1625_vm15 = vweird.f32 %v1611_v10  ;;  %vm1627_vm0 = vcmp.eq.f32.partialorder %v1611_v10, 0.0  ;;  %vm1612_vm4 = vcmp.eq.f32.partialorder %v1611_v10, inf }
 0x213   : > { %v1796_v60 = vpop.eup %1795 }
 0x214   : > { %v1591_v36 = vmul.f32 -0.33333334, %v1796_v60 }
 0x216   : > { %v1798_v30 = vpop.eup %1797  ;;  %1799 = vpow2.f32 %v1591_v36 }
 0x217   : > { %v1615_v32 = vmul.f32 -0.33333334, %v1798_v30 }
 0x219   : > { %1801 = vpow2.f32 %v1615_v32 }
 0x21c   : > { %v1800_v27 = vpop.eup %1799 }
 0x21d   : > { %v1593_v62 = vmul.f32 %v1800_v27, %v1800_v27 }
 0x21f   : > { %v1802_v41 = vpop.eup %1801  ;;  %v1594_v52 = vmul.f32 %v1593_v62, %v1587_v20 }
 0x220   : > { %v1617_v12 = vmul.f32 %v1802_v41, %v1802_v41 }
 0x221   : > { %v1595_v43 = vmul.f32 %v1594_v52, %v1593_v62 }
 0x222   : > { %v1618_v8 = vmul.f32 %v1617_v12, %v1611_v10 }
 0x223   : > { %v1596_v53 = vsub.f32 %v1595_v43, %v1800_v27 }
 0x224   : > { %v1619_v59 = vmul.f32 %v1618_v8, %v1617_v12 }
 0x225   : > { %v1597_v55 = vmul.f32 -0.33333334, %v1596_v53 }
 0x226   : > { %v1620_v38 = vsub.f32 %v1619_v59, %v1802_v41 }
 0x227   : > { %v1598_v46 = vadd.f32 %v1800_v27, %v1597_v55 }
 0x228   : > { %v1621_v44 = vmul.f32 -0.33333334, %v1620_v38 }
 0x229   : > { %v1599_v61 = vmul.f32 %v1598_v46, %v1249_v31 }
 0x22a   : > { %v1622_v54 = vadd.f32 %v1802_v41, %v1621_v44 }
 0x22b   : > { %v1600_v16 = vmul.f32 %v1599_v61, %v1598_v46 }
 0x22c   : > { %v1623_v1 = vmul.f32 %v1622_v54, %v1250_v49 }
 0x22d   : > { %v1602_v2 = vsel %vm1601_vm12, %v1249_v31, %v1600_v16 }
 0x22e   : > { %v1605_v63 = vsel %vm1603_vm13, %v1604_v13, %v1602_v2  ;;  %v1624_v51 = vmul.f32 %v1623_v1, %v1622_v54 }
 0x22f   : > { %v1606_v9 = vsel %vm1586_vm14, nan, %v1605_v63 }
 0x230   : > { %v1626_v39 = vsel %vm1625_vm15, %v1250_v49, %v1624_v51  ;;  %v1607_v37 = vsel %vm1585_vm2, 0.0, %v1606_v9 }
 0x231   : > { %v1629_v57 = vsel %vm1627_vm0, %v1628_v21, %v1626_v39  ;;  %v1608_v19 = vsel %vm1588_vm5, inf, %v1607_v37 }
 0x232   : > { %v1630_v3 = vsel %vm1610_vm1, nan, %v1629_v57 }
 0x233   : > { %v1631_v14 = vsel %vm1609_vm3, 0.0, %v1630_v3 }
 0x234   : > { %v1632_v17 = vsel %vm1612_vm4, inf, %v1631_v14 }
 0x235   : > { %v1255_v24 = vrot.slane %v1632_v17, 7 }
 0x237   : > { %v1256_v18 = vsel %vm440_vm7, %v1608_v19, %v1255_v24 }
 0x238   : > { %1262 = vst.msk [vmem:[%s306_s22] sm:$0x3] %vm1260_vm6, %v1256_v18 }
 0x239   : > { %1980 = shalt.err (!%p1977_p11)
}
 0x23a   : > { %1651 = dma.vmem_to_hbm [thread:$0]  (%p2158_p5), %s1277_s7, 32, %s1279_s12, %s1264_s16  }
 0x23b PF: > { %s1290_s28 = sand.u32 1, %s2015_s18   ;;  %p2867_p12 = scmp.ge.s32.totalorder %s2027_s21, 2 }
 0x23c   : > { %s1291_s24 = scalar_lea.sflag [#allocation4], %s1290_s28 }
 0x23d   : > { %p1671_p13 = pnand %p2867_p12, %p2103_p6 }
 0x23f   : > { %p1672_p0 = pneg %p1671_p13 }
 0x241   : > { %2010 = dma.done.wait (%p1672_p0), %s1291_s24, 32  }
 0x242   : > { %2012 = vsyncadd (%p1672_p0), %s1291_s24, 4294967264  ;;  %p20_p3 = scmp.ge.s32.totalorder %s2145_s11, 4   ;;  %s2868_s18 = smov %s2019_s19 }
 0x243   : > { %s2869_s19 = smov %s2023_s20  ;;  %s2870_s20 = smov %s2154_s14 }
 0x244   : > { %s2871_s21 = smov %s2145_s11  ;;  %22 = sbr.rel (!%p20_p3) target bundleno = 7 (0x7), region = 101 }
 0x249   :  { %1297 = vsyncpa [#allocation3], 1 }
 0x24a   :  { %1299 = vsyncpa [#allocation3 + $0x1], 1 }
 0x24b   :  { %1300 = vsyncpa [#allocation6], 1 }
 0x24c   :  { %1301 = vsyncpa [#allocation9], 1 }
 0x24d   :  { %1302 = vsyncpa [#allocation4], 1 }
 0x24e   :  { %1304 = vsyncpa [#allocation4 + $0x1], 1 }

</bundles_post_ra>
